<compile_context>
chip_gen: v7x
topology: tpu7x:2x2x1
jax: 0.10.0
libtpu: 0.0.40
codegen_flags: <defaults>
</compile_context>

<pallas_src>
import functools
import math

import jax
import jax.numpy as jnp
from jax import lax
from jax.experimental import pallas as pl
from jax.experimental.pallas import tpu as pltpu


# --------------------------------------------------------------------------
# stride == 1 hot path: direct conv, per-tap accumulation, no im2col in HBM.
# --------------------------------------------------------------------------
def _direct_conv_kernel(x_ref, w_ref, b_ref, o_ref, *, kern_h, kern_w,
                        band_rows, w_out):
    """One (image, band) grid step.

    x_ref: (C_in, H_pad, W_pad)      padded image (resident across band axis)
    w_ref: (KH*KW, C_out, C_in)      per-tap weights
    b_ref: (C_out, 1)                bias (f32)
    o_ref: (C_out, band_rows*W_out)  lane-dense transposed output tile (f32)
    """
    c_in = x_ref.shape[0]
    c_out, m_tile = o_ref.shape
    row0 = pl.program_id(1) * band_rows          # first output row of this band

    acc = jnp.zeros((c_out, m_tile), jnp.float32)
    for t in range(kern_h * kern_w):
        dh, dw = divmod(t, kern_w)
        # stride 1: output rows [row0, row0+band_rows) need padded input rows
        # [row0+dh, row0+dh+band_rows) and columns [dw, dw+w_out).
        tap = x_ref[:, pl.ds(row0 + dh, band_rows), pl.ds(dw, w_out)]
        rhs = tap.reshape(c_in, m_tile)                       # (C_in, M_tile)
        acc = acc + jnp.dot(w_ref[t], rhs,
                            preferred_element_type=jnp.float32)
    o_ref[...] = (acc + b_ref[...]).astype(o_ref.dtype)


def _pick_band_rows(h_out, w_out, target_lanes=1024):
    """Output rows per grid step.  band_rows*w_out is the stored lane width:
    keep it a multiple of 128 (unmasked stores) unless the whole image fits."""
    unit = 128 // math.gcd(w_out, 128)      # smallest rb with rb*w_out % 128 == 0
    rb = unit * max(1, target_lanes // (unit * w_out))
    if rb >= h_out or h_out % rb != 0:
        rb = h_out                          # whole image in one band
    return rb


def _conv_stride1(x, weight, bias, padding, compute_dtype):
    n, c_in, h, w = x.shape
    c_out, _, kern_h, kern_w = weight.shape
    h_pad, w_pad = h + 2 * padding, w + 2 * padding
    h_out = h_pad - kern_h + 1
    w_out = w_pad - kern_w + 1

    x_pad = jnp.pad(x, ((0, 0), (0, 0), (padding, padding), (padding, padding)))
    x_pad = x_pad.astype(compute_dtype)
    # per-tap weights, tap index t = dh*KW + dw  ->  (KH*KW, C_out, C_in)
    w_taps = jnp.transpose(weight, (2, 3, 0, 1)).reshape(
        kern_h * kern_w, c_out, c_in).astype(compute_dtype)
    b_col = bias.reshape(c_out, 1).astype(jnp.float32)

    band_rows = _pick_band_rows(h_out, w_out)
    n_bands = h_out // band_rows
    m_tile = band_rows * w_out

    kernel = functools.partial(_direct_conv_kernel, kern_h=kern_h,
                               kern_w=kern_w, band_rows=band_rows, w_out=w_out)

    isz = jnp.dtype(compute_dtype).itemsize
    cost = pl.CostEstimate(
        flops=2 * n * h_out * w_out * kern_h * kern_w * c_in * c_out,
        transcendentals=0,
        bytes_accessed=(x_pad.size * isz + w_taps.size * isz
                        + b_col.size * 4 + n * c_out * h_out * w_out * 4))

    out_flat = pl.pallas_call(
        kernel,
        out_shape=jax.ShapeDtypeStruct((n, c_out, h_out * w_out), jnp.float32),
        grid=(n, n_bands),
        in_specs=[
            # whole padded image; block index depends only on the image index,
            # so the image stays resident in VMEM across the band axis.
            pl.BlockSpec((None, c_in, h_pad, w_pad), lambda i, b: (i, 0, 0, 0)),
            pl.BlockSpec((kern_h * kern_w, c_out, c_in), lambda i, b: (0, 0, 0)),
            pl.BlockSpec((c_out, 1), lambda i, b: (0, 0)),
        ],
        out_specs=pl.BlockSpec((None, c_out, m_tile), lambda i, b: (i, 0, b)),
        compiler_params=pltpu.CompilerParams(
            dimension_semantics=("parallel", "arbitrary")),
        cost_estimate=cost,
    )(x_pad, w_taps, b_col)
    return out_flat.reshape(n, c_out, h_out, w_out)


# --------------------------------------------------------------------------
# stride > 1 fallback: tap-gathered (K, M) per image, single lane-dense matmul.
# --------------------------------------------------------------------------
def _tap_matmul_kernel(p_ref, w_ref, b_ref, o_ref):
    """o = W (C_out, K) @ patches^T (K, M) + bias, one image per grid step."""
    acc = jnp.dot(w_ref[...], p_ref[...], preferred_element_type=jnp.float32)
    o_ref[...] = (acc + b_ref[...]).astype(o_ref.dtype)


def _conv_strided(x, weight, bias, stride, padding, compute_dtype):
    n, c_in, h, w = x.shape
    c_out, _, kern_h, kern_w = weight.shape
    h_out = (h + 2 * padding - kern_h) // stride + 1
    w_out = (w + 2 * padding - kern_w) // stride + 1
    k_dim = kern_h * kern_w * c_in
    m_img = h_out * w_out

    x_pad = jnp.pad(x, ((0, 0), (0, 0), (padding, padding), (padding, padding)))
    taps = []
    for dh in range(kern_h):
        for dw in range(kern_w):
            taps.append(
                x_pad[:, :, dh:dh + (h_out - 1) * stride + 1:stride,
                            dw:dw + (w_out - 1) * stride + 1:stride])
    # (N, KH*KW, C_in, H_out, W_out) -> (N, K, M): K on sublanes, M on lanes.
    patches_t = jnp.stack(taps, axis=1).reshape(n, k_dim, m_img)
    patches_t = patches_t.astype(compute_dtype)
    w_mat = jnp.transpose(weight, (0, 2, 3, 1)).reshape(c_out, k_dim)
    w_mat = w_mat.astype(compute_dtype)
    b_col = bias.reshape(c_out, 1).astype(jnp.float32)

    isz = jnp.dtype(compute_dtype).itemsize
    cost = pl.CostEstimate(
        flops=2 * n * m_img * k_dim * c_out,
        transcendentals=0,
        bytes_accessed=(patches_t.size * isz + w_mat.size * isz
                        + b_col.size * 4 + n * c_out * m_img * 4))

    out_flat = pl.pallas_call(
        _tap_matmul_kernel,
        out_shape=jax.ShapeDtypeStruct((n, c_out, m_img), jnp.float32),
        grid=(n,),
        in_specs=[
            pl.BlockSpec((None, k_dim, m_img), lambda i: (i, 0, 0)),
            pl.BlockSpec((c_out, k_dim), lambda i: (0, 0)),
            pl.BlockSpec((c_out, 1), lambda i: (0, 0)),
        ],
        out_specs=pl.BlockSpec((None, c_out, m_img), lambda i: (i, 0, 0)),
        compiler_params=pltpu.CompilerParams(dimension_semantics=("parallel",)),
        cost_estimate=cost,
    )(patches_t, w_mat, b_col)
    return out_flat.reshape(n, c_out, h_out, w_out)


# --------------------------------------------------------------------------
# public wrapper (matches nn.Conv2d(inplanes, planes, k, stride, padding))
# --------------------------------------------------------------------------
@functools.partial(jax.jit, static_argnames=("stride", "padding", "compute_dtype"))
def first_conv2d(x, weight, bias, *, stride, padding,
                 compute_dtype=jnp.bfloat16):
    """FirstConv2d forward: NCHW input, OIHW weight, bias; NCHW f32 output.

    compute_dtype: dtype of the matmul operands inside the kernel (accumulation,
    bias add and output are always f32).  bf16 halves HBM traffic on v6e/v7x;
    pass jnp.float32 for bit-accurate results.
    """
    if stride == 1:
        return _conv_stride1(x, weight, bias, padding, compute_dtype)
    return _conv_strided(x, weight, bias, stride, padding, compute_dtype)


if __name__ == "__main__":
    key = jax.random.PRNGKey(0)
    k_x, k_w, k_b = jax.random.split(key, 3)

    N, C_in, H, W = 2, 4, 16, 16
    C_out, KH, KW = 8, 3, 3
    stride, padding = 1, 1

    x = jax.random.normal(k_x, (N, C_in, H, W), dtype=jnp.float32)
    weight = jax.random.normal(k_w, (C_out, C_in, KH, KW), dtype=jnp.float32) * 0.1
    bias = jax.random.normal(k_b, (C_out,), dtype=jnp.float32) * 0.1

    def ref_conv(x_, w_, b_, s_, p_):
        return lax.conv_general_dilated(
            x_, w_, window_strides=(s_, s_), padding=[(p_, p_), (p_, p_)],
            dimension_numbers=("NCHW", "OIHW", "NCHW"),
            precision=lax.Precision.HIGHEST,
        ) + b_.reshape(1, -1, 1, 1)

    # 1) bit-accurate f32 path (stride-1 direct-conv kernel)
    out_f32 = jax.block_until_ready(
        first_conv2d(x, weight, bias, stride=stride, padding=padding,
                     compute_dtype=jnp.float32))
    ref = ref_conv(x, weight, bias, stride, padding)
    assert out_f32.shape == (N, C_out, H, W)
    assert jnp.allclose(out_f32, ref, rtol=1e-3, atol=1e-3), "f32 mismatch"

    # 2) default bf16-operand path (f32 accumulation) -- looser tolerance
    out_bf16 = jax.block_until_ready(
        first_conv2d(x, weight, bias, stride=stride, padding=padding))
    assert jnp.allclose(out_bf16, ref, rtol=3e-2, atol=3e-2), "bf16 mismatch"

    # 3) strided fallback path (stride == 2)
    out_s2 = jax.block_until_ready(
        first_conv2d(x, weight, bias, stride=2, padding=padding,
                     compute_dtype=jnp.float32))
    ref_s2 = ref_conv(x, weight, bias, 2, padding)
    assert out_s2.shape == ref_s2.shape
    assert jnp.allclose(out_s2, ref_s2, rtol=1e-3, atol=1e-3), "stride-2 mismatch"

    print("KERNEL_OK")
</pallas_src>

<mosaic_0001>
module attributes {stable_mosaic.version = 11 : i64} {
  func.func @_direct_conv_kernel(%arg0: i32, %arg1: i32, %arg2: memref<1x4x18x18xf32, #tpu.memory_space<vmem>>, %arg3: memref<9x8x4xf32, #tpu.memory_space<vmem>>, %arg4: memref<8x1xf32, #tpu.memory_space<vmem>>, %arg5: memref<1x8x256xf32, #tpu.memory_space<vmem>>) attributes {dimension_semantics = [#tpu.dimension_semantics<parallel>, #tpu.dimension_semantics<arbitrary>], iteration_bounds = array<i64: 2, 1>, scalar_prefetch = 0 : i64, scratch_operands = 0 : i64, tpu.core_type = #tpu.core_type<tc>, window_params = [{transform_indices = @transform_0, window_bounds = array<i64: 1, 4, 18, 18>}, {pipeline_mode = #tpu.pipeline_mode<synchronous>, transform_indices = @transform_1, window_bounds = array<i64: 9, 8, 4>}, {pipeline_mode = #tpu.pipeline_mode<synchronous>, transform_indices = @transform_2, window_bounds = array<i64: 8, 1>}, {transform_indices = @transform_3, window_bounds = array<i64: 1, 8, 256>}]} {
    %c16_i32 = arith.constant 16 : i32
    %0 = arith.muli %arg1, %c16_i32 : i32
    %cst = arith.constant 0.000000e+00 : f32
    %1 = vector.broadcast %cst : f32 to vector<8x256xf32>
    %c0_i32 = arith.constant 0 : i32
    %2 = arith.addi %0, %c0_i32 : i32
    %c0 = arith.constant 0 : index
    %c0_0 = arith.constant 0 : index
    %3 = arith.index_cast %2 : i32 to index
    %c0_1 = arith.constant 0 : index
    %4 = vector.load %arg2[%c0, %c0_0, %3, %c0_1] : memref<1x4x18x18xf32, #tpu.memory_space<vmem>>, vector<1x4x16x16xf32>
    %5 = vector.shape_cast %4 : vector<1x4x16x16xf32> to vector<4x16x16xf32>
    %6 = vector.shape_cast %5 : vector<4x16x16xf32> to vector<4x256xf32>
    %c0_2 = arith.constant 0 : index
    %c0_3 = arith.constant 0 : index
    %c0_4 = arith.constant 0 : index
    %7 = vector.load %arg3[%c0_2, %c0_3, %c0_4] : memref<9x8x4xf32, #tpu.memory_space<vmem>>, vector<1x8x4xf32>
    %8 = vector.shape_cast %7 : vector<1x8x4xf32> to vector<8x4xf32>
    %cst_5 = arith.constant dense<0.000000e+00> : vector<8x256xf32>
    %9 = tpu.matmul %8, %6, %cst_5 {dimension_numbers = #tpu.dot_dimension_numbers<[1], [0], [0], [1], [0, 0, 1, 1], [], []>} : vector<8x4xf32>, vector<4x256xf32>, vector<8x256xf32> -> vector<8x256xf32>
    %10 = arith.addf %1, %9 : vector<8x256xf32>
    %c0_i32_6 = arith.constant 0 : i32
    %11 = arith.addi %0, %c0_i32_6 : i32
    %c0_7 = arith.constant 0 : index
    %c0_8 = arith.constant 0 : index
    %12 = arith.index_cast %11 : i32 to index
    %c1 = arith.constant 1 : index
    %13 = vector.load %arg2[%c0_7, %c0_8, %12, %c1] : memref<1x4x18x18xf32, #tpu.memory_space<vmem>>, vector<1x4x16x16xf32>
    %14 = vector.shape_cast %13 : vector<1x4x16x16xf32> to vector<4x16x16xf32>
    %15 = vector.shape_cast %14 : vector<4x16x16xf32> to vector<4x256xf32>
    %c1_9 = arith.constant 1 : index
    %c0_10 = arith.constant 0 : index
    %c0_11 = arith.constant 0 : index
    %16 = vector.load %arg3[%c1_9, %c0_10, %c0_11] : memref<9x8x4xf32, #tpu.memory_space<vmem>>, vector<1x8x4xf32>
    %17 = vector.shape_cast %16 : vector<1x8x4xf32> to vector<8x4xf32>
    %cst_12 = arith.constant dense<0.000000e+00> : vector<8x256xf32>
    %18 = tpu.matmul %17, %15, %cst_12 {dimension_numbers = #tpu.dot_dimension_numbers<[1], [0], [0], [1], [0, 0, 1, 1], [], []>} : vector<8x4xf32>, vector<4x256xf32>, vector<8x256xf32> -> vector<8x256xf32>
    %19 = arith.addf %10, %18 : vector<8x256xf32>
    %c0_i32_13 = arith.constant 0 : i32
    %20 = arith.addi %0, %c0_i32_13 : i32
    %c0_14 = arith.constant 0 : index
    %c0_15 = arith.constant 0 : index
    %21 = arith.index_cast %20 : i32 to index
    %c2 = arith.constant 2 : index
    %22 = vector.load %arg2[%c0_14, %c0_15, %21, %c2] : memref<1x4x18x18xf32, #tpu.memory_space<vmem>>, vector<1x4x16x16xf32>
    %23 = vector.shape_cast %22 : vector<1x4x16x16xf32> to vector<4x16x16xf32>
    %24 = vector.shape_cast %23 : vector<4x16x16xf32> to vector<4x256xf32>
    %c2_16 = arith.constant 2 : index
    %c0_17 = arith.constant 0 : index
    %c0_18 = arith.constant 0 : index
    %25 = vector.load %arg3[%c2_16, %c0_17, %c0_18] : memref<9x8x4xf32, #tpu.memory_space<vmem>>, vector<1x8x4xf32>
    %26 = vector.shape_cast %25 : vector<1x8x4xf32> to vector<8x4xf32>
    %cst_19 = arith.constant dense<0.000000e+00> : vector<8x256xf32>
    %27 = tpu.matmul %26, %24, %cst_19 {dimension_numbers = #tpu.dot_dimension_numbers<[1], [0], [0], [1], [0, 0, 1, 1], [], []>} : vector<8x4xf32>, vector<4x256xf32>, vector<8x256xf32> -> vector<8x256xf32>
    %28 = arith.addf %19, %27 : vector<8x256xf32>
    %c1_i32 = arith.constant 1 : i32
    %29 = arith.addi %0, %c1_i32 : i32
    %c0_20 = arith.constant 0 : index
    %c0_21 = arith.constant 0 : index
    %30 = arith.index_cast %29 : i32 to index
    %c0_22 = arith.constant 0 : index
    %31 = vector.load %arg2[%c0_20, %c0_21, %30, %c0_22] : memref<1x4x18x18xf32, #tpu.memory_space<vmem>>, vector<1x4x16x16xf32>
    %32 = vector.shape_cast %31 : vector<1x4x16x16xf32> to vector<4x16x16xf32>
    %33 = vector.shape_cast %32 : vector<4x16x16xf32> to vector<4x256xf32>
    %c3 = arith.constant 3 : index
    %c0_23 = arith.constant 0 : index
    %c0_24 = arith.constant 0 : index
    %34 = vector.load %arg3[%c3, %c0_23, %c0_24] : memref<9x8x4xf32, #tpu.memory_space<vmem>>, vector<1x8x4xf32>
    %35 = vector.shape_cast %34 : vector<1x8x4xf32> to vector<8x4xf32>
    %cst_25 = arith.constant dense<0.000000e+00> : vector<8x256xf32>
    %36 = tpu.matmul %35, %33, %cst_25 {dimension_numbers = #tpu.dot_dimension_numbers<[1], [0], [0], [1], [0, 0, 1, 1], [], []>} : vector<8x4xf32>, vector<4x256xf32>, vector<8x256xf32> -> vector<8x256xf32>
    %37 = arith.addf %28, %36 : vector<8x256xf32>
    %c1_i32_26 = arith.constant 1 : i32
    %38 = arith.addi %0, %c1_i32_26 : i32
    %c0_27 = arith.constant 0 : index
    %c0_28 = arith.constant 0 : index
    %39 = arith.index_cast %38 : i32 to index
    %c1_29 = arith.constant 1 : index
    %40 = vector.load %arg2[%c0_27, %c0_28, %39, %c1_29] : memref<1x4x18x18xf32, #tpu.memory_space<vmem>>, vector<1x4x16x16xf32>
    %41 = vector.shape_cast %40 : vector<1x4x16x16xf32> to vector<4x16x16xf32>
    %42 = vector.shape_cast %41 : vector<4x16x16xf32> to vector<4x256xf32>
    %c4 = arith.constant 4 : index
    %c0_30 = arith.constant 0 : index
    %c0_31 = arith.constant 0 : index
    %43 = vector.load %arg3[%c4, %c0_30, %c0_31] : memref<9x8x4xf32, #tpu.memory_space<vmem>>, vector<1x8x4xf32>
    %44 = vector.shape_cast %43 : vector<1x8x4xf32> to vector<8x4xf32>
    %cst_32 = arith.constant dense<0.000000e+00> : vector<8x256xf32>
    %45 = tpu.matmul %44, %42, %cst_32 {dimension_numbers = #tpu.dot_dimension_numbers<[1], [0], [0], [1], [0, 0, 1, 1], [], []>} : vector<8x4xf32>, vector<4x256xf32>, vector<8x256xf32> -> vector<8x256xf32>
    %46 = arith.addf %37, %45 : vector<8x256xf32>
    %c1_i32_33 = arith.constant 1 : i32
    %47 = arith.addi %0, %c1_i32_33 : i32
    %c0_34 = arith.constant 0 : index
    %c0_35 = arith.constant 0 : index
    %48 = arith.index_cast %47 : i32 to index
    %c2_36 = arith.constant 2 : index
    %49 = vector.load %arg2[%c0_34, %c0_35, %48, %c2_36] : memref<1x4x18x18xf32, #tpu.memory_space<vmem>>, vector<1x4x16x16xf32>
    %50 = vector.shape_cast %49 : vector<1x4x16x16xf32> to vector<4x16x16xf32>
    %51 = vector.shape_cast %50 : vector<4x16x16xf32> to vector<4x256xf32>
    %c5 = arith.constant 5 : index
    %c0_37 = arith.constant 0 : index
    %c0_38 = arith.constant 0 : index
    %52 = vector.load %arg3[%c5, %c0_37, %c0_38] : memref<9x8x4xf32, #tpu.memory_space<vmem>>, vector<1x8x4xf32>
    %53 = vector.shape_cast %52 : vector<1x8x4xf32> to vector<8x4xf32>
    %cst_39 = arith.constant dense<0.000000e+00> : vector<8x256xf32>
    %54 = tpu.matmul %53, %51, %cst_39 {dimension_numbers = #tpu.dot_dimension_numbers<[1], [0], [0], [1], [0, 0, 1, 1], [], []>} : vector<8x4xf32>, vector<4x256xf32>, vector<8x256xf32> -> vector<8x256xf32>
    %55 = arith.addf %46, %54 : vector<8x256xf32>
    %c2_i32 = arith.constant 2 : i32
    %56 = arith.addi %0, %c2_i32 : i32
    %c0_40 = arith.constant 0 : index
    %c0_41 = arith.constant 0 : index
    %57 = arith.index_cast %56 : i32 to index
    %c0_42 = arith.constant 0 : index
    %58 = vector.load %arg2[%c0_40, %c0_41, %57, %c0_42] : memref<1x4x18x18xf32, #tpu.memory_space<vmem>>, vector<1x4x16x16xf32>
    %59 = vector.shape_cast %58 : vector<1x4x16x16xf32> to vector<4x16x16xf32>
    %60 = vector.shape_cast %59 : vector<4x16x16xf32> to vector<4x256xf32>
    %c6 = arith.constant 6 : index
    %c0_43 = arith.constant 0 : index
    %c0_44 = arith.constant 0 : index
    %61 = vector.load %arg3[%c6, %c0_43, %c0_44] : memref<9x8x4xf32, #tpu.memory_space<vmem>>, vector<1x8x4xf32>
    %62 = vector.shape_cast %61 : vector<1x8x4xf32> to vector<8x4xf32>
    %cst_45 = arith.constant dense<0.000000e+00> : vector<8x256xf32>
    %63 = tpu.matmul %62, %60, %cst_45 {dimension_numbers = #tpu.dot_dimension_numbers<[1], [0], [0], [1], [0, 0, 1, 1], [], []>} : vector<8x4xf32>, vector<4x256xf32>, vector<8x256xf32> -> vector<8x256xf32>
    %64 = arith.addf %55, %63 : vector<8x256xf32>
    %c2_i32_46 = arith.constant 2 : i32
    %65 = arith.addi %0, %c2_i32_46 : i32
    %c0_47 = arith.constant 0 : index
    %c0_48 = arith.constant 0 : index
    %66 = arith.index_cast %65 : i32 to index
    %c1_49 = arith.constant 1 : index
    %67 = vector.load %arg2[%c0_47, %c0_48, %66, %c1_49] : memref<1x4x18x18xf32, #tpu.memory_space<vmem>>, vector<1x4x16x16xf32>
    %68 = vector.shape_cast %67 : vector<1x4x16x16xf32> to vector<4x16x16xf32>
    %69 = vector.shape_cast %68 : vector<4x16x16xf32> to vector<4x256xf32>
    %c7 = arith.constant 7 : index
    %c0_50 = arith.constant 0 : index
    %c0_51 = arith.constant 0 : index
    %70 = vector.load %arg3[%c7, %c0_50, %c0_51] : memref<9x8x4xf32, #tpu.memory_space<vmem>>, vector<1x8x4xf32>
    %71 = vector.shape_cast %70 : vector<1x8x4xf32> to vector<8x4xf32>
    %cst_52 = arith.constant dense<0.000000e+00> : vector<8x256xf32>
    %72 = tpu.matmul %71, %69, %cst_52 {dimension_numbers = #tpu.dot_dimension_numbers<[1], [0], [0], [1], [0, 0, 1, 1], [], []>} : vector<8x4xf32>, vector<4x256xf32>, vector<8x256xf32> -> vector<8x256xf32>
    %73 = arith.addf %64, %72 : vector<8x256xf32>
    %c2_i32_53 = arith.constant 2 : i32
    %74 = arith.addi %0, %c2_i32_53 : i32
    %c0_54 = arith.constant 0 : index
    %c0_55 = arith.constant 0 : index
    %75 = arith.index_cast %74 : i32 to index
    %c2_56 = arith.constant 2 : index
    %76 = vector.load %arg2[%c0_54, %c0_55, %75, %c2_56] : memref<1x4x18x18xf32, #tpu.memory_space<vmem>>, vector<1x4x16x16xf32>
    %77 = vector.shape_cast %76 : vector<1x4x16x16xf32> to vector<4x16x16xf32>
    %78 = vector.shape_cast %77 : vector<4x16x16xf32> to vector<4x256xf32>
    %c8 = arith.constant 8 : index
    %c0_57 = arith.constant 0 : index
    %c0_58 = arith.constant 0 : index
    %79 = vector.load %arg3[%c8, %c0_57, %c0_58] : memref<9x8x4xf32, #tpu.memory_space<vmem>>, vector<1x8x4xf32>
    %80 = vector.shape_cast %79 : vector<1x8x4xf32> to vector<8x4xf32>
    %cst_59 = arith.constant dense<0.000000e+00> : vector<8x256xf32>
    %81 = tpu.matmul %80, %78, %cst_59 {dimension_numbers = #tpu.dot_dimension_numbers<[1], [0], [0], [1], [0, 0, 1, 1], [], []>} : vector<8x4xf32>, vector<4x256xf32>, vector<8x256xf32> -> vector<8x256xf32>
    %82 = arith.addf %73, %81 : vector<8x256xf32>
    %c0_60 = arith.constant 0 : index
    %c0_61 = arith.constant 0 : index
    %83 = vector.load %arg4[%c0_60, %c0_61] : memref<8x1xf32, #tpu.memory_space<vmem>>, vector<8x1xf32>
    %84 = vector.broadcast %83 : vector<8x1xf32> to vector<8x256xf32>
    %85 = arith.addf %82, %84 : vector<8x256xf32>
    %c0_62 = arith.constant 0 : index
    %c0_63 = arith.constant 0 : index
    %c0_64 = arith.constant 0 : index
    %86 = vector.load %arg5[%c0_62, %c0_63, %c0_64] : memref<1x8x256xf32, #tpu.memory_space<vmem>>, vector<1x8x256xf32>
    %87 = vector.shape_cast %86 : vector<1x8x256xf32> to vector<8x256xf32>
    %88 = vector.shape_cast %85 : vector<8x256xf32> to vector<1x8x256xf32>
    tpu.vector_store %arg5[%c0_62, %c0_63, %c0_64], %88 {strides = array<i32>} : memref<1x8x256xf32, #tpu.memory_space<vmem>>, vector<1x8x256xf32>,
    return
  }
  func.func @transform_0(%arg0: i32, %arg1: i32) -> (i32, i32, i32, i32) {
    %c0_i32 = arith.constant 0 : i32
    %c0_i32_0 = arith.constant 0 : i32
    %c0_i32_1 = arith.constant 0 : i32
    %c0_i32_2 = arith.constant 0 : i32
    return %arg0, %c0_i32, %c0_i32_0, %c0_i32_1 : i32, i32, i32, i32
  }
  func.func @transform_1(%arg0: i32, %arg1: i32) -> (i32, i32, i32) {
    %c0_i32 = arith.constant 0 : i32
    %c0_i32_0 = arith.constant 0 : i32
    %c0_i32_1 = arith.constant 0 : i32
    %c0_i32_2 = arith.constant 0 : i32
    return %c0_i32, %c0_i32_0, %c0_i32_1 : i32, i32, i32
  }
  func.func @transform_2(%arg0: i32, %arg1: i32) -> (i32, i32) {
    %c0_i32 = arith.constant 0 : i32
    %c0_i32_0 = arith.constant 0 : i32
    %c0_i32_1 = arith.constant 0 : i32
    return %c0_i32, %c0_i32_0 : i32, i32
  }
  func.func @transform_3(%arg0: i32, %arg1: i32) -> (i32, i32, i32) {
    %c0_i32 = arith.constant 0 : i32
    %c0_i32_0 = arith.constant 0 : i32
    return %arg0, %c0_i32, %arg1 : i32, i32, i32
  }
}

</mosaic_0001>

<bundles_post_ra>
// kernel: first_conv2d.1
= control target key start
LH: loop header
LB: loop body
LE: loop exit
PB: predicated region body
PF: predicated region fallthrough
CT: control target
= control target key end

     0   :  { %s3403_s12 = smov 0   ;;  %s3405_s13 = smov 0   ;;  %s4622_s0 = inlined_call_operand.vmem [shape: f32[2,4,18,18], index: 0, kind: input, shape index: {}]   ;;  %s4623_s1 = inlined_call_operand.vmem [shape: f32[9,8,4], index: 1, kind: input, shape index: {}]   ;;  %s4624_s2 = inlined_call_operand.vmem [shape: f32[8,1], index: 2, kind: input, shape index: {}]   ;;  %s4625_s3 = inlined_call_operand.vmem [shape: f32[2,8,256], index: 3, kind: output, shape index: {}]  }
   0x1   :  { %s3407_s14 = smov 0  }
   0x2 LB: > { %s25_s15 = sadd.s32 1, %s3364_s13  ;;  %p3173_p0 = scmp.ge.s32.totalorder %s3368_s14, 1  ;;  %s3368_s14 = sphi %s3407_s14, %s13_s14   ;;  %s3364_s13 = sphi %s3405_s13, %s4640_s13   ;;  %s3360_s12 = sphi %s3403_s12, %s4639_s12  }
   0x3   : > { %p27_p1 = scmp.ge.s32.totalorder %s25_s15, 2  ;;  %p151_p2 = scmp.lt.s32.totalorder %s3368_s14, 3 }
   0x5   : > { %s4642_s15 = smov (%p27_p1, %s25_s15), 0  ;;  %p152_p3 = pnand %p3173_p0, %p151_p2 }
   0x7   : > { %155 = sbr.rel (%p152_p3) target bundleno = 739 (0x2e3), region = 32 }
   0xe   : > { %p179_p4 = scmp.lt.s32.totalorder %s3360_s12, 1  ;;  %v3370_v0 = vmov 1983009808   ;;  %v209_v2 = vlaneseq  ;;  %s3371_s20 = smov 127   ;;  %v3372_v9 = vmov 0.0   ;;  %vm396_vm0 = vcmask 130048  }
   0xf   : > { %v207_v1 = vunpack.c.l.s4 %v3370_v0  ;;  %1771 = vmatprep.mubr.f32.mxu0 %v3372_v9  ;;  %733 = vmatprep.mubr.f32.mxu1 %v3372_v9  ;;  %s3373_s21 = smov 126   ;;  %s3375_s22 = smov 32   ;;  %vm398_vm1 = vcmask 261120   ;;  %vm400_vm2 = vcmask 392192   ;;  %vm402_vm3 = vcmask 523264  }
  0x10   : > { %s4644_s12 = smov (!%p179_p4, %s3360_s12), 1  ;;  %v3431_v6 = vshrl.u32 %v209_v2, 7  ;;  %s3376_s23 = smov 64   ;;  %vm404_vm4 = vcmask 654336   ;;  %vm406_vm5 = vcmask 785408   ;;  %vm408_vm6 = vcmask 916480  }
  0x11   : > { %s3279_s16 = smul.u32 96, %s4644_s12  ;;  %v208_v5 = vunpack.c.0.s8 %v207_v1  ;;  %s3377_s24 = smov 96   ;;  %vm662_vm7 = vcmask 1043456   ;;  %vm658_vm8 = vcmask 31744  }
  0x12   : > { %s3378_s25 = smov 16   ;;  %s3379_s26 = smov 48  }
  0x13   : > { %s3427_s19 = scalar_lea.vmem %s4622_s0, %s3279_s16  ;;  %v3450_v14 = vsub.s32 %v208_v5, %v3431_v6  ;;  %s3380_s27 = smov 80  }
  0x14   : > { %v3205_v3 = vld [vmem:[%s3427_s19 + $0x39] sm:$0xff]  ;;  %v3201_v4 = vld [vmem:[%s3427_s19 + $0x9] sm:$0xff]  ;;  %v3207_v7 = vld [vmem:[%s3427_s19 + $0x51] sm:$0xff]  ;;  %s3381_s28 = smov 112  }
  0x15   : > { %1476 = vrot.lane.b32.xlu1 %v3205_v3, %s3371_s20  ;;  %1468 = vrot.lane.b32.xlu0 %v3201_v4, %s3371_s20  ;;  %v3203_v8 = vld [vmem:[%s3427_s19 + $0x21] sm:$0xff]  ;;  %v3443_v11 = vld [vmem:[%s3427_s19 + $0x50] sm:$0xff] }
  0x16   : > { %v3440_v10 = vld [vmem:[%s3427_s19 + $0x20] sm:$0xff]  ;;  %v3447_v13 = vld [vmem:[%s3427_s19 + $0x8] sm:$0xff]  ;;  %v3457_v17 = vld [vmem:[%s3427_s19 + $0x38] sm:$0xff] }
  0x17   : > { %v3202_v12 = vld [vmem:[%s3427_s19 + $0x19] sm:$0xff]  ;;  %v288_v15 = vcombine.low %v3440_v10, %v3443_v11  ;;  %v289_v16 = vcombine.high %v3440_v10, %v3443_v11  ;;  %v272_v18 = vcombine.low %v3447_v13, %v3457_v17  ;;  %v273_v19 = vcombine.high %v3447_v13, %v3457_v17  ;;  %v3469_v21 = vld [vmem:[%s3427_s19 + $0x48] sm:$0xff]  ;;  %v3483_v27 = vld [vmem:[%s3427_s19 + $0x30] sm:$0xff] }
  0x18   : > { %v3466_v20 = vld [vmem:[%s3427_s19 + $0x18] sm:$0xff]  ;;  %v3200_v22 = vld [vmem:[%s3427_s19 + $0x1] sm:$0xff]  ;;  %v3206_v31 = vld [vmem:[%s3427_s19 + $0x49] sm:$0xff] }
  0x19   : > { %1480 = vrot.lane.b32.xlu1 %v3207_v7, %s3371_s20  ;;  %1472 = vrot.lane.b32.xlu0 %v3203_v8, %s3371_s20  ;;  %v3473_v23 = vrot.slane %v289_v16, %v3450_v14  ;;  %v3476_v24 = vld [vmem:[%s3427_s19] sm:$0xff]  ;;  %v220_v25 = vcombine.low %v3466_v20, %v3469_v21  ;;  %v221_v26 = vcombine.high %v3466_v20, %v3469_v21  ;;  %v3204_v32 = vld [vmem:[%s3427_s19 + $0x31] sm:$0xff] }
  0x1a   : > { %v3486_v28 = vrot.slane %v273_v19, %v3450_v14  ;;  %v204_v29 = vcombine.low %v3476_v24, %v3483_v27  ;;  %v205_v30 = vcombine.high %v3476_v24, %v3483_v27  ;;  %v3237_v39 = vld [vmem:[%s3427_s19 + $0xa] sm:$0xff]  ;;  %v3239_v40 = vld [vmem:[%s3427_s19 + $0x22] sm:$0xff]  ;;  %v3241_v41 = vld [vmem:[%s3427_s19 + $0x3a] sm:$0xff]  ;;  %v3572_v47 = vrot.slane %v288_v15, %v3450_v14 }
  0x1b   : > { %v3495_v33 = vrot.slane %v221_v26, %v3450_v14  ;;  %v3243_v42 = vld [vmem:[%s3427_s19 + $0x52] sm:$0xff]  ;;  %v3236_v43 = vld [vmem:[%s3427_s19 + $0x2] sm:$0xff]  ;;  %v3238_v44 = vld [vmem:[%s3427_s19 + $0x1a] sm:$0xff]  ;;  %v3578_v48 = vrot.slane %v272_v18, %v3450_v14  ;;  %v2188_v49 = vcombine.low %v3237_v39, %v3241_v41  ;;  %v3586_v51 = vrot.slane %v220_v25, %v3450_v14 }
  0x1c   : > { %v3504_v36 = vrot.slane %v205_v30, %v3450_v14  ;;  %v3240_v45 = vld [vmem:[%s3427_s19 + $0x32] sm:$0xff]  ;;  %v3242_v46 = vld [vmem:[%s3427_s19 + $0x4a] sm:$0xff]  ;;  %v2204_v50 = vcombine.low %v3239_v40, %v3243_v42  ;;  %v3589_v52 = vrot.slane %v204_v29, %v3450_v14 }
  0x1d   : > { %1470 = vrot.lane.b32.xlu1 %v3202_v12, %s3371_s20  ;;  %1466 = vrot.lane.b32.xlu0 %v3200_v22, %s3371_s20  ;;  %v304_v53 = vcombine.low %v3578_v48, %v3572_v47  ;;  %v3596_v54 = vrot.slane %v2188_v49, %v3450_v14  ;;  %v2120_v58 = vcombine.low %v3236_v43, %v3240_v45 }
  0x1e   : > { %v3599_v55 = vrot.slane %v2204_v50, %v3450_v14  ;;  %v236_v57 = vcombine.low %v3589_v52, %v3586_v51  ;;  %v2136_v59 = vcombine.low %v3238_v44, %v3242_v46  ;;  %v305_v62 = vcombine.high %v3578_v48, %v3572_v47 }
  0x1f   : > { %v3608_v60 = vrot.slane %v2120_v58, %v3450_v14  ;;  %v2121_v15 = vcombine.high %v3236_v43, %v3240_v45  ;;  %v2137_v16 = vcombine.high %v3238_v44, %v3242_v46  ;;  %v4628_v47 = vcombine.high %v3589_v52, %v3586_v51 }
  0x20   : > { %v2220_v56 = vcombine.low %v3596_v54, %v3599_v55  ;;  %v3611_v61 = vrot.slane %v2136_v59, %v3450_v14  ;;  %v2221_v0 = vcombine.high %v3596_v54, %v3599_v55 }
  0x21   : > { %1478 = vrot.lane.b32.xlu1 %v3206_v31, %s3371_s20  ;;  %1474 = vrot.lane.b32.xlu0 %v3204_v32, %s3371_s20  ;;  %v3637_v18 = vrot.slane %v2137_v16, %v3450_v14 }
  0x22   : > { %v2152_v63 = vcombine.low %v3608_v60, %v3611_v61  ;;  %v4629_v54 = vcombine.high %v3608_v60, %v3611_v61 }
  0x25   : > { %432 = vrot.lane.b32.xlu1 %v3440_v10, %s3371_s20  ;;  %428 = vrot.lane.b32.xlu0 %v3447_v13, %s3371_s20 }
  0x29   : > { %440 = vrot.lane.b32.xlu1 %v3443_v11, %s3371_s20  ;;  %436 = vrot.lane.b32.xlu0 %v3457_v17, %s3371_s20 }
  0x2d   : > { %1802 = vrot.lane.b32.xlu1 %v3203_v8, %s3373_s21  ;;  %1798 = vrot.lane.b32.xlu0 %v3201_v4, %s3373_s21  ;;  %v2205_v4 = vcombine.high %v3239_v40, %v3243_v42 }
  0x31   : > { %1810 = vrot.lane.b32.xlu1 %v3207_v7, %s3373_s21  ;;  %1806 = vrot.lane.b32.xlu0 %v3205_v3, %s3373_s21  ;;  %v2189_v3 = vcombine.high %v3237_v39, %v3241_v41  ;;  %v3629_v7 = vrot.slane %v2205_v4, %v3450_v14 }
  0x33   : > { %v3626_v5 = vrot.slane %v2189_v3, %v3450_v14 }
  0x35   : > { %430 = vrot.lane.b32.xlu1 %v3466_v20, %s3371_s20  ;;  %426 = vrot.lane.b32.xlu0 %v3476_v24, %s3371_s20 }
  0x39   : > { %438 = vrot.lane.b32.xlu1 %v3469_v21, %s3371_s20  ;;  %434 = vrot.lane.b32.xlu0 %v3483_v27, %s3371_s20 }
  0x3d   : > { %1800 = vrot.lane.b32.xlu1 %v3202_v12, %s3373_s21  ;;  %1796 = vrot.lane.b32.xlu0 %v3200_v22, %s3373_s21 }
  0x41   : > { %1808 = vrot.lane.b32.xlu1 %v3206_v31, %s3373_s21  ;;  %1804 = vrot.lane.b32.xlu0 %v3204_v32, %s3373_s21 }
  0x45   : > { %838 = vrot.lane.b32.xlu0 %v3447_v13, %s3373_s21  ;;  %842 = vrot.lane.b32.xlu1 %v3440_v10, %s3373_s21  ;;  %v3374_v10 = vmov 1934713408  }
  0x49   : > { %846 = vrot.lane.b32.xlu0 %v3457_v17, %s3373_s21  ;;  %850 = vrot.lane.b32.xlu1 %v3443_v11, %s3373_s21  ;;  %v239_v11 = vunpack.c.l.s4 %v3374_v10  ;;  %v3634_v17 = vrot.slane %v2121_v15, %v3450_v14 }
  0x4d   : > { %2428 = vrot.lane.b32.xlu0 %v3237_v39, %s3371_s20  ;;  %2432 = vrot.lane.b32.xlu1 %v3239_v40, %s3371_s20 }
  0x51   : > { %2436 = vrot.lane.b32.xlu0 %v3241_v41, %s3371_s20  ;;  %2440 = vrot.lane.b32.xlu1 %v3243_v42, %s3371_s20 }
  0x55   : > { %836 = vrot.lane.b32.xlu0 %v3476_v24, %s3373_s21  ;;  %840 = vrot.lane.b32.xlu1 %v3466_v20, %s3373_s21  ;;  %v240_v20 = vunpack.c.0.s8 %v239_v11 }
  0x57   : > { %v3645_v32 = vsub.s32 %v240_v20, %v3431_v6 }
  0x59   : > { %844 = vrot.lane.b32.xlu0 %v3483_v27, %s3373_s21  ;;  %848 = vrot.lane.b32.xlu1 %v3469_v21, %s3373_s21  ;;  %v251_v48 = vrot.slane %v4628_v47, %v3645_v32  ;;  %v2167_v55 = vrot.slane %v4629_v54, %v3645_v32 }
  0x5b   : > { %v269_v51 = vcombine.high %v251_v48, %v3372_v9  ;;  %v2185_v61 = vcombine.high %v2167_v55, %v3372_v9 }
  0x5d   : > { %2426 = vrot.lane.b32.xlu0 %v3236_v43, %s3371_s20  ;;  %2430 = vrot.lane.b32.xlu1 %v3238_v44, %s3371_s20 }
  0x61   : > { %2434 = vrot.lane.b32.xlu0 %v3240_v45, %s3371_s20  ;;  %2438 = vrot.lane.b32.xlu1 %v3242_v46, %s3371_s20 }
  0x65   : > { %2758 = vrot.lane.b32.xlu0 %v3237_v39, %s3373_s21  ;;  %2762 = vrot.lane.b32.xlu1 %v3239_v40, %s3373_s21 }
  0x69   : > { %2766 = vrot.lane.b32.xlu0 %v3241_v41, %s3373_s21  ;;  %2770 = vrot.lane.b32.xlu1 %v3243_v42, %s3373_s21 }
  0x6d   : > { %2756 = vrot.lane.b32.xlu0 %v3236_v43, %s3373_s21  ;;  %2760 = vrot.lane.b32.xlu1 %v3238_v44, %s3373_s21 }
  0x71   : > { %2764 = vrot.lane.b32.xlu0 %v3240_v45, %s3373_s21  ;;  %2768 = vrot.lane.b32.xlu1 %v3242_v46, %s3373_s21 }
  0x87   : > { %v1477_v12 = vpop.permute.xlu1 %1476  ;;  %v1469_v13 = vpop.permute.xlu0 %1468 }
  0x88   : > { %v1558_v19 = vcombine.low %v1469_v13, %v1477_v12  ;;  %v1559_v21 = vcombine.high %v1469_v13, %v1477_v12 }
  0x8a   : > { %v1566_v29 = vrot.slane %v1558_v19, %v3450_v14  ;;  %v1573_v39 = vrot.slane %v1559_v21, %v3450_v14 }
  0x8b   : > { %v1481_v22 = vpop.permute.xlu1 %1480  ;;  %v1473_v24 = vpop.permute.xlu0 %1472 }
  0x8c   : > { %v1574_v26 = vcombine.low %v1473_v24, %v1481_v22  ;;  %v1575_v27 = vcombine.high %v1473_v24, %v1481_v22 }
  0x8e   : > { %v1582_v30 = vrot.slane %v1574_v26, %v3450_v14  ;;  %v1589_v31 = vrot.slane %v1575_v27, %v3450_v14 }
  0x8f   : > { %v1471_v40 = vpop.permute.xlu1 %1470  ;;  %v1467_v41 = vpop.permute.xlu0 %1466 }
  0x90   : > { %v1591_v42 = vcombine.high %v1566_v29, %v1582_v30  ;;  %v1606_v43 = vcombine.low %v1573_v39, %v1589_v31  ;;  %v1590_v12 = vcombine.low %v1566_v29, %v1582_v30  ;;  %v1607_v16 = vcombine.high %v1573_v39, %v1589_v31 }
  0x92   : > { %v1605_v44 = vrot.slane %v1591_v42, %v3645_v32  ;;  %v1614_v6 = vrot.slane %v1606_v43, %v3645_v32  ;;  %v1621_v27 = vrot.slane %v1607_v16, %v3645_v32  ;;  %v3671_v29 = vrot.slane %v1590_v12, %v3645_v32 }
  0x93   : > { %v1479_v45 = vpop.permute.xlu1 %1478  ;;  %v1475_v46 = vpop.permute.xlu0 %1474 }
  0x94   : > { %v1506_v49 = vcombine.low %v1471_v40, %v1479_v45  ;;  %v1507_v50 = vcombine.high %v1471_v40, %v1479_v45  ;;  %v1490_v58 = vcombine.low %v1467_v41, %v1475_v46  ;;  %v1491_v59 = vcombine.high %v1467_v41, %v1475_v46  ;;  %1659 = vrot.lane.b32.xlu0 %v1605_v44, %s3375_s22 }
  0x95   : > { %v1624_v30 = vcombine.high %v1614_v6, %v3372_v9 }
  0x96   : > { %v1514_v3 = vrot.slane %v1506_v49, %v3450_v14  ;;  %v1521_v4 = vrot.slane %v1507_v50, %v3450_v14  ;;  %v1498_v10 = vrot.slane %v1490_v58, %v3450_v14  ;;  %v1505_v11 = vrot.slane %v1491_v59, %v3450_v14 }
  0x97   : > { %v3655_v13 = vpop.permute.xlu1 %432  ;;  %v3657_v15 = vpop.permute.xlu0 %428  ;;  %v1622_v49 = vcombine.high %v3671_v29, %v3372_v9 }
  0x98   : > { %1667 = vrot.lane.b32.xlu0 %v1614_v6, %s3376_s23  ;;  %v1523_v20 = vcombine.high %v1498_v10, %v1514_v3  ;;  %v1538_v22 = vcombine.low %v1505_v11, %v1521_v4  ;;  %v1539_v43 = vcombine.high %v1505_v11, %v1521_v4  ;;  %v1623_v4 = vcombine.high %v1605_v44, %v3372_v9 }
  0x9a   : > { %v3663_v21 = vrot.slane %v1523_v20, %v3645_v32  ;;  %v1546_v42 = vrot.slane %v1538_v22, %v3645_v32  ;;  %v1553_v50 = vrot.slane %v1539_v43, %v3645_v32  ;;  %v1522_v20 = vcombine.low %v1498_v10, %v1514_v3 }
  0x9b   : > { %v3665_v24 = vpop.permute.xlu1 %440  ;;  %v3667_v26 = vpop.permute.xlu0 %436 }
  0x9c   : > { %v534_v31 = vcombine.low %v3655_v13, %v3665_v24  ;;  %v518_v39 = vcombine.low %v3657_v15, %v3667_v26  ;;  %1631 = vrot.lane.b32.xlu1 %v3663_v21, %s3375_s22  ;;  %1675 = vrot.lane.b32.xlu0 %v1621_v27, %s3377_s24  ;;  %v3722_v10 = vrot.slane %v1522_v20, %v3645_v32 }
  0x9d   : > { %v1557_v2 = vcombine.high %v1553_v50, %v3372_v9 }
  0x9e   : > { %v542_v40 = vrot.slane %v534_v31, %v3450_v14  ;;  %v526_v41 = vrot.slane %v518_v39, %v3450_v14 }
  0x9f   : > { %v3685_v45 = vpop.permute.xlu1 %1802  ;;  %v3687_v46 = vpop.permute.xlu0 %1798 }
  0xa0   : > { %1639 = vrot.lane.b32.xlu1 %v1546_v42, %s3376_s23  ;;  %1655 = vrot.lane.b32.xlu0 %v1622_v49, %s3378_s25  ;;  %v551_v58 = vcombine.high %v526_v41, %v542_v40  ;;  %v550_v44 = vcombine.low %v526_v41, %v542_v40 }
  0xa2   : > { %v3708_v39 = vrot.slane %v551_v58, %v3645_v32  ;;  %v1625_v58 = vcombine.high %v1621_v27, %v3372_v9  ;;  %v3730_v6 = vrot.slane %v550_v44, %v3645_v32  ;;  %v1554_v27 = vcombine.high %v3722_v10, %v3372_v9 }
  0xa3   : > { %v3694_v59 = vpop.permute.xlu1 %1810  ;;  %v3696_v12 = vpop.permute.xlu0 %1806 }
  0xa4   : > { %v1904_v11 = vcombine.low %v3685_v45, %v3694_v59  ;;  %v1888_v16 = vcombine.low %v3687_v46, %v3696_v12  ;;  %1647 = vrot.lane.b32.xlu1 %v1553_v50, %s3377_s24  ;;  %1663 = vrot.lane.b32.xlu0 %v1623_v4, %s3379_s26  ;;  %v582_v44 = vcombine.high %v3730_v6, %v3372_v9 }
  0xa6   : > { %v1912_v22 = vrot.slane %v1904_v11, %v3450_v14  ;;  %v1896_v31 = vrot.slane %v1888_v16, %v3450_v14 }
  0xa7   : > { %v3710_v43 = vpop.permute.xlu1 %430  ;;  %v3712_v49 = vpop.permute.xlu0 %426 }
  0xa8   : > { %619 = vrot.lane.b32.xlu1 %v3708_v39, %s3375_s22  ;;  %v1921_v38 = vcombine.high %v1896_v31, %v1912_v22  ;;  %1671 = vrot.lane.b32.xlu0 %v1624_v30, %s3380_s27 }
  0xaa   : > { %v3719_v3 = vrot.slane %v1921_v38, %v3645_v32 }
  0xab   : > { %v3724_v40 = vpop.permute.xlu1 %438  ;;  %v3726_v41 = vpop.permute.xlu0 %434 }
  0xac   : > { %v466_v4 = vcombine.low %v3710_v43, %v3724_v40  ;;  %v450_v30 = vcombine.low %v3712_v49, %v3726_v41  ;;  %1989 = vrot.lane.b32.xlu1 %v3719_v3, %s3375_s22  ;;  %1679 = vrot.lane.b32.xlu0 %v1625_v58, %s3381_s28  ;;  %v1555_v58 = vcombine.high %v3663_v21, %v3372_v9 }
  0xad   : > { %v1556_v21 = vcombine.high %v1546_v42, %v3372_v9  ;;  %v519_v42 = vcombine.high %v3657_v15, %v3667_v26  ;;  %v1889_v15 = vcombine.high %v3687_v46, %v3696_v12  ;;  %v467_v26 = vcombine.high %v3710_v43, %v3724_v40 }
  0xae   : > { %v474_v38 = vrot.slane %v466_v4, %v3450_v14  ;;  %v458_v11 = vrot.slane %v450_v30, %v3450_v14 }
  0xaf   : > { %v3743_v16 = vpop.permute.xlu1 %1800  ;;  %v3745_v20 = vpop.permute.xlu0 %1796  ;;  %v1903_v46 = vrot.slane %v1889_v15, %v3450_v14 }
  0xb0   : > { %v482_v19 = vcombine.low %v458_v11, %v474_v38  ;;  %1627 = vrot.lane.b32.xlu1 %v1554_v27, %s3378_s25  ;;  %615 = vrot.lane.b32.xlu0 %v582_v44, %s3378_s25  ;;  %v1920_v27 = vcombine.low %v1896_v31, %v1912_v22 }
  0xb2   : > { %v3754_v4 = vrot.slane %v482_v19, %v3645_v32 }
  0xb3   : > { %v1809_v30 = vpop.permute.xlu1 %1808  ;;  %v1805_v35 = vpop.permute.xlu0 %1804 }
  0xb4   : > { %v1836_v25 = vcombine.low %v3743_v16, %v1809_v30  ;;  %v1820_v37 = vcombine.low %v3745_v20, %v1805_v35  ;;  %1635 = vrot.lane.b32.xlu1 %v1555_v58, %s3379_s26  ;;  %v514_v8 = vcombine.high %v3754_v4, %v3372_v9  ;;  %v3771_v58 = vrot.slane %v1920_v27, %v3645_v32 }
  0xb5   : > { %v1821_v40 = vcombine.high %v3745_v20, %v1805_v35 }
  0xb6   : > { %v1844_v44 = vrot.slane %v1836_v25, %v3450_v14  ;;  %v1828_v34 = vrot.slane %v1820_v37, %v3450_v14  ;;  %587 = vrot.lane.b32.xlu0 %v514_v8, %s3378_s25  ;;  %v483_v25 = vcombine.high %v458_v11, %v474_v38  ;;  %v535_v8 = vcombine.high %v3655_v13, %v3665_v24 }
  0xb7   : > { %v1952_v50 = vcombine.high %v3771_v58, %v3372_v9  ;;  %v3783_v22 = vpop.permute.xlu0 %838  ;;  %v533_v11 = vrot.slane %v519_v42, %v3450_v14  ;;  %v1905_v13 = vcombine.high %v3685_v45, %v3694_v59  ;;  %v583_v24 = vcombine.high %v3708_v39, %v3372_v9 }
  0xb8   : > { %v1852_v19 = vcombine.low %v1828_v34, %v1844_v44  ;;  %1643 = vrot.lane.b32.xlu1 %v1556_v21, %s3380_s27  ;;  %v1853_v31 = vcombine.high %v1828_v34, %v1844_v44  ;;  %v549_v38 = vrot.slane %v535_v8, %v3450_v14  ;;  %v451_v34 = vcombine.high %v3712_v49, %v3726_v41  ;;  %v3815_v21 = vpop.permute.xlu1 %842 }
  0xb9   : > { %v1919_v45 = vrot.slane %v1905_v13, %v3450_v14  ;;  %v1953_v59 = vcombine.high %v3719_v3, %v3372_v9  ;;  %v481_v39 = vrot.slane %v467_v26, %v3450_v14  ;;  %v1837_v49 = vcombine.high %v3743_v16, %v1809_v30 }
  0xba   : > { %v3768_v1 = vrot.slane %v1852_v19, %v3645_v32  ;;  %v1867_v27 = vrot.slane %v1853_v31, %v3645_v32  ;;  %v566_v12 = vcombine.low %v533_v11, %v549_v38  ;;  %v465_v43 = vrot.slane %v451_v34, %v3450_v14 }
  0xbb   : > { %v3802_v44 = vpop.permute.xlu0 %846  ;;  %v1936_v3 = vcombine.low %v1903_v46, %v1919_v45  ;;  %v1835_v8 = vrot.slane %v1821_v40, %v3450_v14  ;;  %v567_v26 = vcombine.high %v533_v11, %v549_v38 }
  0xbc   : > { %1651 = vrot.lane.b32.xlu1 %v1557_v2, %s3381_s28  ;;  %v1884_v37 = vcombine.high %v3768_v1, %v3372_v9  ;;  %v497_v2 = vrot.slane %v483_v25, %v3645_v32  ;;  %v574_v19 = vrot.slane %v566_v12, %v3645_v32  ;;  %v1851_v25 = vrot.slane %v1837_v49, %v3450_v14  ;;  %v3827_v30 = vpop.permute.xlu1 %850 }
  0xbd   : > { %v1885_v35 = vcombine.high %v1867_v27, %v3372_v9  ;;  %v498_v16 = vcombine.low %v465_v43, %v481_v39  ;;  %v1944_v20 = vrot.slane %v1936_v3, %v3645_v32  ;;  %v1937_v12 = vcombine.high %v1903_v46, %v1919_v45 }
  0xbe   : > { %1957 = vrot.lane.b32.xlu0 %v1884_v37, %s3378_s25  ;;  %v515_v41 = vcombine.high %v497_v2, %v3372_v9  ;;  %v584_v31 = vcombine.high %v574_v19, %v3372_v9  ;;  %v1869_v3 = vcombine.high %v1835_v8, %v1851_v25 }
  0xbf   : > { %v3819_v37 = vpop.permute.xlu0 %2428  ;;  %v506_v42 = vrot.slane %v498_v16, %v3645_v32  ;;  %v1951_v38 = vrot.slane %v1937_v12, %v3645_v32 }
  0xc0   : > { %1985 = vrot.lane.b32.xlu1 %v1952_v50, %s3378_s25  ;;  %v1868_v50 = vcombine.low %v1835_v8, %v1851_v25  ;;  %v3837_v15 = vpop.permute.xlu1 %2432  ;;  %v3873_v25 = vrot.slane %v304_v53, %v3645_v32 }
  0xc2   : > { %591 = vrot.lane.b32.xlu0 %v497_v2, %s3375_s22  ;;  %v1876_v13 = vrot.slane %v1868_v50, %v3645_v32  ;;  %v336_v53 = vcombine.high %v3873_v25, %v3372_v9 }
  0xc3   : > { %v3831_v2 = vpop.permute.xlu0 %2436 }
  0xc4   : > { %623 = vrot.lane.b32.xlu1 %v583_v24, %s3379_s26  ;;  %v1954_v24 = vcombine.high %v1944_v20, %v3372_v9  ;;  %v3847_v49 = vpop.permute.xlu1 %2440  ;;  %v1886_v40 = vcombine.high %v1876_v13, %v3372_v9 }
  0xc6   : > { %1961 = vrot.lane.b32.xlu0 %v1867_v27, %s3375_s22  ;;  %v516_v27 = vcombine.high %v506_v42, %v3372_v9 }
  0xc7   : > { %v3841_v34 = vpop.permute.xlu0 %836 }
  0xc8   : > { %1993 = vrot.lane.b32.xlu1 %v1953_v59, %s3379_s26  ;;  %v581_v59 = vrot.slane %v567_v26, %v3645_v32 }
  0xca   : > { %595 = vrot.lane.b32.xlu0 %v515_v41, %s3379_s26  ;;  %v499_v41 = vcombine.high %v465_v43, %v481_v39  ;;  %v585_v45 = vcombine.high %v581_v59, %v3372_v9  ;;  %v1883_v39 = vrot.slane %v1869_v3, %v3645_v32  ;;  %v1955_v43 = vcombine.high %v1951_v38, %v3372_v9 }
  0xcb   : > { %v4630_v3 = vcombine.low %v3486_v28, %v3473_v23 }
  0xcc   : > { %627 = vrot.lane.b32.xlu1 %v574_v19, %s3376_s23  ;;  %v3851_v19 = vpop.permute.xlu0 %844  ;;  %v513_v11 = vrot.slane %v499_v41, %v3645_v32  ;;  %v1887_v50 = vcombine.high %v1883_v39, %v3372_v9 }
  0xcd   : > { %v328_v60 = vrot.slane %v4630_v3, %v3645_v32 }
  0xce   : > { %1965 = vrot.lane.b32.xlu0 %v1885_v35, %s3379_s26  ;;  %v3857_v35 = vpop.permute.xlu1 %840  ;;  %v517_v8 = vcombine.high %v513_v11, %v3372_v9 }
  0xd0   : > { %1997 = vrot.lane.b32.xlu1 %v1944_v20, %s3376_s23  ;;  %v3861_v46 = vpop.permute.xlu0 %2426  ;;  %v3881_v20 = vrot.slane %v2220_v56, %v3645_v32 }
  0xd2   : > { %599 = vrot.lane.b32.xlu0 %v506_v42, %s3376_s23  ;;  %v3867_v16 = vpop.permute.xlu1 %848  ;;  %v2252_v56 = vcombine.high %v3881_v20, %v3372_v9 }
  0xd4   : > { %631 = vrot.lane.b32.xlu1 %v584_v31, %s3380_s27  ;;  %v3883_v42 = vpop.permute.xlu0 %2434  ;;  %v3893_v31 = vrot.slane %v236_v57, %v3645_v32  ;;  %v3909_v57 = vrot.slane %v2152_v63, %v3645_v32  ;;  %v2235_v63 = vrot.slane %v2221_v0, %v3645_v32 }
  0xd6   : > { %1969 = vrot.lane.b32.xlu0 %v1876_v13, %s3376_s23  ;;  %v3898_v13 = vpop.permute.xlu1 %2430  ;;  %4627 = vst [vmem:[#allocation2_spill] sm:$0xff] %v3909_v57  ;;  %v2184_v12 = vcombine.high %v3909_v57, %v3372_v9  ;;  %v2253_v0 = vcombine.high %v2235_v63, %v3372_v9 }
  0xd8   : > { %2001 = vrot.lane.b32.xlu1 %v1954_v24, %s3380_s27  ;;  %v268_v24 = vcombine.high %v3893_v31, %v3372_v9  ;;  %v3903_v26 = vpop.permute.xlu0 %2758 }
  0xda   : > { %603 = vrot.lane.b32.xlu0 %v516_v27, %s3380_s27  ;;  %v319_v27 = vrot.slane %v305_v62, %v3645_v32 }
  0xdc   : > { %635 = vrot.lane.b32.xlu1 %v581_v59, %s3377_s24  ;;  %v3917_v59 = vpop.permute.xlu1 %2438  ;;  %v337_v41 = vcombine.high %v319_v27, %v3372_v9 }
  0xde   : > { %1973 = vrot.lane.b32.xlu0 %v1886_v40, %s3380_s27  ;;  %v3926_v40 = vpop.permute.xlu0 %2766 }
  0xe0   : > { %2005 = vrot.lane.b32.xlu1 %v1951_v38, %s3377_s24  ;;  %v3934_v62 = vpop.permute.xlu1 %2762 }
  0xe2   : > { %607 = vrot.lane.b32.xlu0 %v513_v11, %s3377_s24  ;;  %v3938_v38 = vpop.permute.xlu0 %2756 }
  0xe4   : > { %639 = vrot.lane.b32.xlu1 %v585_v45, %s3381_s28  ;;  %v3947_v52 = vpop.permute.xlu1 %2770 }
  0xe6   : > { %1977 = vrot.lane.b32.xlu0 %v1883_v39, %s3377_s24  ;;  %v3951_v11 = vpop.permute.xlu0 %2764  ;;  %v4631_v39 = vcombine.low %v3626_v5, %v3629_v7 }
  0xe8   : > { %2009 = vrot.lane.b32.xlu1 %v1955_v43, %s3381_s28  ;;  %v3959_v45 = vpop.permute.xlu1 %2760  ;;  %v2244_v43 = vrot.slane %v4631_v39, %v3645_v32 }
  0xea   : > { %611 = vrot.lane.b32.xlu0 %v517_v8, %s3381_s28  ;;  %v2254_v47 = vcombine.high %v2244_v43, %v3372_v9 }
  0xec   : > { %1981 = vrot.lane.b32.xlu1 %v1887_v50, %s3381_s28  ;;  %v4632_v50 = vcombine.low %v3504_v36, %v3495_v33 }
  0xee   : > { %369 = vrot.lane.b32.xlu0 %v336_v53, %s3378_s25  ;;  %v260_v53 = vrot.slane %v4632_v50, %v3645_v32  ;;  %v2518_v50 = vcombine.low %v3819_v37, %v3831_v2 }
  0xf0   : > { %2285 = vrot.lane.b32.xlu1 %v2252_v56, %s3378_s25  ;;  %v338_v56 = vcombine.high %v328_v60, %v3372_v9 }
  0xf2   : > { %341 = vrot.lane.b32.xlu0 %v268_v24, %s3378_s25  ;;  %v3973_v24 = vpop.permute.xlu1 %2768 }
  0xf4   : > { %373 = vrot.lane.b32.xlu1 %v319_v27, %s3375_s22 }
  0xf6   : > { %2257 = vrot.lane.b32.xlu0 %v2184_v12, %s3378_s25  ;;  %v4633_v12 = vcombine.low %v3634_v17, %v3637_v18 }
  0xf8   : > { %2289 = vrot.lane.b32.xlu1 %v2235_v63, %s3375_s22  ;;  %v2176_v63 = vrot.slane %v4633_v12, %v3645_v32 }
  0xfa   : > { %345 = vrot.lane.b32.xlu0 %v251_v48, %s3375_s22  ;;  %v2186_v3 = vcombine.high %v2176_v63, %v3372_v9 }
  0xfc   : > { %377 = vrot.lane.b32.xlu1 %v337_v41, %s3379_s26  ;;  %v270_v41 = vcombine.high %v260_v53, %v3372_v9 }
  0xfe   : > { %2261 = vrot.lane.b32.xlu0 %v2167_v55, %s3375_s22  ;;  %v4634_v55 = vcombine.high %v3486_v28, %v3473_v23  ;;  %v4635_v23 = vcombine.high %v3626_v5, %v3629_v7  ;;  %v860_v7 = vcombine.low %v3841_v34, %v3851_v19 }
 0x100   : > { %2293 = vrot.lane.b32.xlu1 %v2253_v0, %s3379_s26  ;;  %v335_v0 = vrot.slane %v4634_v55, %v3645_v32  ;;  %v2251_v28 = vrot.slane %v4635_v23, %v3645_v32  ;;  %v876_v55 = vcombine.low %v3857_v35, %v3867_v16  ;;  %v4048_v23 = vrot.slane %v860_v7, %v3450_v14 }
 0x102   : > { %349 = vrot.lane.b32.xlu0 %v269_v51, %s3379_s26 }
 0x104   : > { %381 = vrot.lane.b32.xlu1 %v328_v60, %s3376_s23  ;;  %v928_v60 = vcombine.low %v3783_v22, %v3802_v44 }
 0x106   : > { %v1660_v8 = vpop.permute.xlu0 %1659  ;;  %2265 = vrot.lane.b32.xlu0 %v2185_v61, %s3379_s26  ;;  %v944_v61 = vcombine.low %v3815_v21, %v3827_v30 }
 0x108   : > { %2297 = vrot.lane.b32.xlu1 %v2244_v43, %s3376_s23  ;;  %v4021_v5 = vrot.slane %v944_v61, %v3450_v14 }
 0x10a   : > { %v1668_v27 = vpop.permute.xlu0 %1667  ;;  %353 = vrot.lane.b32.xlu0 %v260_v53, %s3376_s23  ;;  %v2534_v53 = vcombine.low %v3837_v15, %v3847_v49 }
 0x10c   : > { %385 = vrot.lane.b32.xlu1 %v338_v56, %s3380_s27 }
 0x10e   : > { %v3982_v48 = vpop.permute.xlu1 %1631  ;;  %2269 = vrot.lane.b32.xlu0 %v2176_v63, %s3376_s23  ;;  %v1676_v54 = vpop.permute.xlu0 %1675  ;;  %v4018_v63 = vrot.slane %v928_v60, %v3450_v14  ;;  %v4035_v60 = vrot.slane %v2534_v53, %v3450_v14 }
 0x110   : > { %2301 = vrot.lane.b32.xlu1 %v2254_v47, %s3380_s27 }
 0x112   : > { %v3991_v51 = vpop.permute.xlu1 %1639  ;;  %357 = vrot.lane.b32.xlu0 %v270_v41, %s3380_s27  ;;  %v1656_v39 = vpop.permute.xlu0 %1655 }
 0x113   : > { %v1689_v43 = vsel %vm396_vm0, %v3671_v29, %v1656_v39  ;;  %v4636_v29 = vcombine.high %v3504_v36, %v3495_v33  ;;  %v339_v33 = vcombine.high %v335_v0, %v3372_v9  ;;  %v4032_v36 = vrot.slane %v2518_v50, %v3450_v14 }
 0x114   : > { %389 = vrot.lane.b32.xlu1 %v335_v0, %s3377_s24  ;;  %v1690_v47 = vsel %vm398_vm1, %v1689_v43, %v1660_v8  ;;  %v4637_v8 = vcombine.high %v3634_v17, %v3637_v18  ;;  %v2255_v43 = vcombine.high %v2251_v28, %v3372_v9  ;;  %v960_v0 = vcombine.low %v4018_v63, %v4021_v5 }
 0x115   : > { %v267_v12 = vrot.slane %v4636_v29, %v3645_v32  ;;  %v4052_v29 = vrot.slane %v876_v55, %v3450_v14  ;;  %v2466_v17 = vcombine.low %v3898_v13, %v3917_v59 }
 0x116   : > { %v4010_v56 = vpop.permute.xlu1 %1647  ;;  %2273 = vrot.lane.b32.xlu0 %v2186_v3, %s3380_s27  ;;  %v1664_v41 = vpop.permute.xlu0 %1663  ;;  %v2183_v39 = vrot.slane %v4637_v8, %v3645_v32  ;;  %v4069_v8 = vrot.slane %v960_v0, %v3645_v32 }
 0x117   : > { %v1691_v3 = vsel %vm400_vm2, %v1690_v47, %v1664_v41  ;;  %v2450_v47 = vcombine.low %v3861_v46, %v3883_v42  ;;  %v271_v7 = vcombine.high %v267_v12, %v3372_v9 }
 0x118   : > { %2305 = vrot.lane.b32.xlu1 %v2251_v28, %s3377_s24  ;;  %v1692_v50 = vsel %vm402_vm3, %v1691_v3, %v1668_v27  ;;  %v2550_v28 = vcombine.low %v4032_v36, %v4035_v60  ;;  %v2187_v3 = vcombine.high %v2183_v39, %v3372_v9 }
 0x11a   : > { %v4037_v61 = vpop.permute.xlu1 %619  ;;  %361 = vrot.lane.b32.xlu0 %v267_v12, %s3377_s24  ;;  %v1672_v53 = vpop.permute.xlu0 %1671 }
 0x11b   : > { %v1693_v18 = vsel %vm404_vm4, %v1692_v50, %v1672_v53  ;;  %v2458_v50 = vrot.slane %v2450_v47, %v3450_v14  ;;  %v2474_v53 = vrot.slane %v2466_v17, %v3450_v14  ;;  %v992_v47 = vcombine.high %v4069_v8, %v3372_v9 }
 0x11c   : > { %393 = vrot.lane.b32.xlu1 %v339_v33, %s3381_s28  ;;  %v1694_v55 = vsel %vm406_vm5, %v1693_v18, %v1676_v54  ;;  %v892_v33 = vcombine.low %v4048_v23, %v4052_v29  ;;  %v4080_v54 = vrot.slane %v2550_v28, %v3645_v32 }
 0x11d   : > { %v2482_v0 = vcombine.low %v2458_v50, %v2474_v53 }
 0x11e   : > { %v4062_v27 = vpop.permute.xlu1 %1989  ;;  %2277 = vrot.lane.b32.xlu0 %v2183_v39, %s3377_s24  ;;  %v1680_v41 = vpop.permute.xlu0 %1679 }
 0x11f   : > { %v1695_v57 = vsel %vm408_vm6, %v1694_v55, %v1680_v41 }
 0x120   : > { %2309 = vrot.lane.b32.xlu1 %v2255_v43, %s3381_s28  ;;  %3209 = vmatprep.subr.msk.mxu0 %vm662_vm7, %v1695_v57  ;;  %v4088_v43 = vrot.slane %v892_v33, %v3645_v32  ;;  %v961_v57 = vcombine.high %v4018_v63, %v4021_v5  ;;  %v4104_v63 = vrot.slane %v2482_v0, %v3645_v32 }
 0x122   : > { %v1628_v12 = vpop.permute.xlu1 %1627  ;;  %365 = vrot.lane.b32.xlu0 %v271_v7, %s3381_s28  ;;  %v4098_v7 = vpop.permute.xlu0 %615  ;;  %v924_v41 = vcombine.high %v4088_v43, %v3372_v9 }
 0x123   : > { %v1682_v39 = vsel %vm396_vm0, %v3722_v10, %v1628_v12  ;;  %v2582_v10 = vcombine.high %v4080_v54, %v3372_v9  ;;  %v893_v12 = vcombine.high %v4048_v23, %v4052_v29  ;;  %v3208_v29 = vld [vmem:[%s4623_s1 + $0x20] sm:$0xff] }
 0x124   : > { %2281 = vrot.lane.b32.xlu1 %v2187_v3, %s3381_s28  ;;  %v1683_v17 = vsel %vm398_vm1, %v1682_v39, %v3982_v48  ;;  %v2551_v48 = vcombine.high %v4032_v36, %v4035_v60  ;;  %v975_v3 = vrot.slane %v961_v57, %v3645_v32  ;;  %v2514_v36 = vcombine.high %v4104_v63, %v3372_v9 }
 0x125   : > { %v945_v60 = vcombine.high %v3815_v21, %v3827_v30 }
 0x126   : > { %v1636_v18 = vpop.permute.xlu1 %1635  ;;  %1025 = vrot.lane.b32.xlu0 %v992_v47, %s3378_s25  ;;  %v2565_v47 = vrot.slane %v2551_v48, %v3645_v32 }
 0x127   : > { %v1684_v28 = vsel %vm400_vm2, %v1683_v17, %v1636_v18  ;;  %v2483_v17 = vcombine.high %v2458_v50, %v2474_v53  ;;  %v959_v30 = vrot.slane %v945_v60, %v3450_v14  ;;  %v2535_v50 = vcombine.high %v3837_v15, %v3847_v49 }
 0x128   : > { %2615 = vrot.lane.b32.xlu1 %v2582_v10, %s3378_s25  ;;  %v1685_v5 = vsel %vm402_vm3, %v1684_v28, %v3991_v51  ;;  %v4115_v39 = vpop.permute.xlu0 %587  ;;  %v929_v51 = vcombine.high %v3783_v22, %v3802_v44  ;;  %v907_v44 = vrot.slane %v893_v12, %v3645_v32  ;;  %v993_v18 = vcombine.high %v975_v3, %v3372_v9 }
 0x129   : > { %v861_v10 = vcombine.high %v3841_v34, %v3851_v19  ;;  %v877_v28 = vcombine.high %v3857_v35, %v3867_v16  ;;  %v2583_v34 = vcombine.high %v2565_v47, %v3372_v9  ;;  %v2451_v16 = vcombine.high %v3861_v46, %v3883_v42 }
 0x12a   : > { %v1644_v55 = vpop.permute.xlu1 %1643  ;;  %997 = vrot.lane.b32.xlu0 %v924_v41, %s3378_s25  ;;  %v4138_v21 = vrot.slane %v929_v51, %v3450_v14  ;;  %v2549_v41 = vrot.slane %v2535_v50, %v3450_v14 }
 0x12b   : > { %v1686_v33 = vsel %vm404_vm4, %v1685_v5, %v1644_v55  ;;  %v875_v19 = vrot.slane %v861_v10, %v3450_v14  ;;  %v891_v35 = vrot.slane %v877_v28, %v3450_v14  ;;  %v2467_v5 = vcombine.high %v3898_v13, %v3917_v59  ;;  %v3334_v28 = vld [vmem:[%s3427_s19 + $0x9] ss:$48 sps:$4 sm:$0xff]  }
 0x12c   : > { %1029 = vrot.lane.b32.xlu1 %v975_v3, %s3375_s22  ;;  %v1687_v23 = vsel %vm406_vm5, %v1686_v33, %v4010_v56  ;;  %v2519_v56 = vcombine.high %v3819_v37, %v3831_v2  ;;  %v2497_v2 = vrot.slane %v2483_v17, %v3645_v32  ;;  %v976_v15 = vcombine.low %v4138_v21, %v959_v30 }
 0x12d   : > { %v925_v3 = vcombine.high %v907_v44, %v3372_v9  ;;  %v908_v51 = vcombine.low %v875_v19, %v891_v35  ;;  %v2465_v60 = vrot.slane %v2451_v16, %v3450_v14  ;;  %v2481_v46 = vrot.slane %v2467_v5, %v3450_v14 }
 0x12e   : > { %v1652_v0 = vpop.permute.xlu1 %1651  ;;  %2587 = vrot.lane.b32.xlu0 %v2514_v36, %s3378_s25  ;;  %v2533_v49 = vrot.slane %v2519_v56, %v3450_v14  ;;  %v984_v36 = vrot.slane %v976_v15, %v3645_v32  ;;  %v2515_v13 = vcombine.high %v2497_v2, %v3372_v9  ;;  %v977_v50 = vcombine.high %v4138_v21, %v959_v30 }
 0x12f   : > { %v1688_v57 = vsel %vm408_vm6, %v1687_v23, %v1652_v0  ;;  %v4214_v30 = vrot.slane %v3334_v28, %v3450_v14 }
 0x130   : > { %2619 = vrot.lane.b32.xlu1 %v2565_v47, %s3375_s22  ;;  %3210 = vmatpush1.msk.msra.mxu0 %vm662_vm7, %v1688_v57  ;;  %v4134_v22 = vpop.permute.xlu0 %1957  ;;  %v2566_v33 = vcombine.low %v2533_v49, %v2549_v41  ;;  %v2498_v47 = vcombine.low %v2465_v60, %v2481_v46  ;;  %v994_v17 = vcombine.high %v984_v36, %v3372_v9 }
 0x131   : > { %3211 = vmatmul.mubr.msk.f32.vlgmr.msra.gmra.mrb[0].mxu0 %vm658_vm8, %v3208_v29  ;;  %v916_v29 = vrot.slane %v908_v51, %v3645_v32  ;;  %v2567_v16 = vcombine.high %v2533_v49, %v2549_v41  ;;  %v991_v21 = vrot.slane %v977_v50, %v3645_v32  ;;  %v2499_v49 = vcombine.high %v2465_v60, %v2481_v46  ;;  %v3338_v41 = vld [vmem:[%s3427_s19 + $0x1] ss:$48 sps:$4 sm:$0xff]  }
 0x132   : > { %v4146_v53 = vpop.permute.xlu1 %1985  ;;  %1001 = vrot.lane.b32.xlu0 %v907_v44, %s3375_s22  ;;  %2101 = vmatprep.mubr.f32.mxu0 %v3372_v9  ;;  %v2574_v0 = vrot.slane %v2566_v33, %v3645_v32  ;;  %v2506_v56 = vrot.slane %v2498_v47, %v3645_v32  ;;  %v909_v33 = vcombine.high %v875_v19, %v891_v35 }
 0x133   : > { %v2864_v47 = vcombine.low %v3934_v62, %v3947_v52  ;;  %v2581_v19 = vrot.slane %v2567_v16, %v3645_v32  ;;  %v649_v60 = vsel %vm396_vm0, %v3730_v6, %v4098_v7  ;;  %v2513_v50 = vrot.slane %v2499_v49, %v3645_v32 }
 0x134   : > { %1033 = vrot.lane.b32.xlu1 %v993_v18, %s3379_s26  ;;  %v4156_v37 = vpop.permute.xlu0 %591  ;;  %v2584_v10 = vcombine.high %v2574_v0, %v3372_v9  ;;  %v2516_v51 = vcombine.high %v2506_v56, %v3372_v9  ;;  %v650_v7 = vsel %vm398_vm1, %v649_v60, %v4037_v61  ;;  %v2796_v49 = vcombine.low %v3959_v45, %v3973_v24 }
 0x135   : > { %v4250_v6 = vrot.slane %v2864_v47, %v3450_v14 }
 0x136   : > { %v4162_v48 = vpop.permute.xlu1 %623  ;;  %2591 = vrot.lane.b32.xlu0 %v2497_v2, %s3375_s22  ;;  %v3336_v2 = vld [vmem:[%s3427_s19 + $0x21] ss:$48 sps:$4 sm:$0xff]  }
 0x138   : > { %2623 = vrot.lane.b32.xlu1 %v2583_v34, %s3379_s26  ;;  %v4173_v55 = vpop.permute.xlu0 %1961  ;;  %v926_v34 = vcombine.high %v916_v29, %v3372_v9 }
 0x13a   : > { %v4176_v12 = vpop.permute.xlu1 %1993  ;;  %1005 = vrot.lane.b32.xlu0 %v925_v3, %s3379_s26  ;;  %v4217_v3 = vrot.slane %v3336_v2, %v3450_v14 }
 0x13c   : > { %1037 = vrot.lane.b32.xlu1 %v984_v36, %s3376_s23  ;;  %v4183_v42 = vpop.permute.xlu0 %595  ;;  %v1260_v35 = vcombine.low %v4214_v30, %v4217_v3 }
 0x13e   : > { %v628_v59 = vpop.permute.xlu1 %627  ;;  %2595 = vrot.lane.b32.xlu0 %v2515_v13, %s3379_s26  ;;  %v3340_v13 = vld [vmem:[%s3427_s19 + $0x19] ss:$48 sps:$4 sm:$0xff]   ;;  %v4256_v16 = vrot.slane %v1260_v35, %v3645_v32  ;;  %v2517_v35 = vcombine.high %v2513_v50, %v3372_v9 }
 0x13f   : > { %v4244_v28 = vrot.slane %v3340_v13, %v3450_v14  ;;  %v2585_v13 = vcombine.high %v2581_v19, %v3372_v9 }
 0x140   : > { %2627 = vrot.lane.b32.xlu1 %v2574_v0, %s3376_s23  ;;  %v4189_v23 = vpop.permute.xlu0 %1965  ;;  %v2848_v0 = vcombine.low %v3903_v26, %v3926_v40 }
 0x142   : > { %v4192_v57 = vpop.permute.xlu1 %1997  ;;  %1009 = vrot.lane.b32.xlu0 %v916_v29, %s3376_s23  ;;  %v4247_v2 = vrot.slane %v2848_v0, %v3450_v14 }
 0x144   : > { %1041 = vrot.lane.b32.xlu1 %v994_v17, %s3380_s27  ;;  %v4197_v44 = vpop.permute.xlu0 %599  ;;  %v923_v17 = vrot.slane %v909_v33, %v3645_v32  ;;  %v2019_v33 = vsel %vm396_vm0, %v3771_v58, %v4146_v53  ;;  %v2880_v53 = vcombine.low %v4247_v2, %v4250_v6 }
 0x146   : > { %v632_v18 = vpop.permute.xlu1 %631  ;;  %2599 = vrot.lane.b32.xlu0 %v2506_v56, %s3376_s23  ;;  %v995_v56 = vcombine.high %v991_v21, %v3372_v9  ;;  %v927_v47 = vcombine.high %v923_v17, %v3372_v9 }
 0x148   : > { %2631 = vrot.lane.b32.xlu1 %v2584_v10, %s3380_s27  ;;  %v4206_v15 = vpop.permute.xlu0 %1969  ;;  %v4241_v10 = vrot.slane %v3338_v41, %v3450_v14 }
 0x14a   : > { %v4209_v5 = vpop.permute.xlu1 %2001  ;;  %1013 = vrot.lane.b32.xlu0 %v926_v34, %s3380_s27  ;;  %v1192_v58 = vcombine.low %v4241_v10, %v4244_v28 }
 0x14c   : > { %1045 = vrot.lane.b32.xlu1 %v991_v21, %s3377_s24  ;;  %v4220_v36 = vpop.permute.xlu0 %603  ;;  %v2780_v21 = vcombine.low %v3938_v38, %v3951_v11 }
 0x14e   : > { %v636_v29 = vpop.permute.xlu1 %635  ;;  %2603 = vrot.lane.b32.xlu0 %v2516_v51, %s3380_s27  ;;  %v651_v51 = vsel %vm400_vm2, %v650_v7, %v4162_v48  ;;  %v2020_v48 = vsel %vm398_vm1, %v2019_v33, %v4062_v27 }
 0x14f   : > { %v652_v61 = vsel %vm402_vm3, %v651_v51, %v628_v59 }
 0x150   : > { %2635 = vrot.lane.b32.xlu1 %v2581_v19, %s3377_s24  ;;  %v1974_v46 = vpop.permute.xlu0 %1973  ;;  %v653_v0 = vsel %vm404_vm4, %v652_v61, %v632_v18  ;;  %v1292_v18 = vcombine.high %v4256_v16, %v3372_v9  ;;  %v4284_v19 = vrot.slane %v2780_v21, %v3450_v14 }
 0x151   : > { %v654_v59 = vsel %vm406_vm5, %v653_v0, %v636_v29  ;;  %v4293_v29 = vrot.slane %v2796_v49, %v3450_v14 }
 0x152   : > { %v2006_v34 = vpop.permute.xlu1 %2005  ;;  %1017 = vrot.lane.b32.xlu0 %v923_v17, %s3377_s24  ;;  %v642_v17 = vsel %vm396_vm0, %v3754_v4, %v4115_v39  ;;  %v2012_v4 = vsel %vm396_vm0, %v3768_v1, %v4134_v22  ;;  %v4318_v1 = vrot.slane %v2880_v53, %v3645_v32 }
 0x154   : > { %1049 = vrot.lane.b32.xlu1 %v995_v56, %s3381_s28  ;;  %v608_v41 = vpop.permute.xlu0 %607  ;;  %v2021_v56 = vsel %vm400_vm2, %v2020_v48, %v4176_v12  ;;  %v2881_v48 = vcombine.high %v4247_v2, %v4250_v6 }
 0x155   : > { %v2022_v7 = vsel %vm402_vm3, %v2021_v56, %v4192_v57  ;;  %v2013_v57 = vsel %vm398_vm1, %v2012_v4, %v4173_v55  ;;  %v1261_v55 = vcombine.high %v4214_v30, %v4217_v3  ;;  %v3342_v56 = vld [vmem:[%s3427_s19 + $0xd] ss:$48 sps:$4 sm:$0xff]  }
 0x156   : > { %v640_v60 = vpop.permute.xlu1 %639  ;;  %2607 = vrot.lane.b32.xlu0 %v2513_v50, %s3377_s24  ;;  %v643_v50 = vsel %vm398_vm1, %v642_v17, %v4156_v37  ;;  %v2023_v12 = vsel %vm404_vm4, %v2022_v7, %v4209_v5  ;;  %v4309_v37 = vrot.slane %v1192_v58, %v3645_v32  ;;  %v2014_v22 = vsel %vm400_vm2, %v2013_v57, %v4189_v23 }
 0x157   : > { %v655_v27 = vsel %vm408_vm6, %v654_v59, %v640_v60  ;;  %v644_v39 = vsel %vm400_vm2, %v643_v50, %v4183_v42  ;;  %v2024_v51 = vsel %vm406_vm5, %v2023_v12, %v2006_v34  ;;  %v2015_v34 = vsel %vm402_vm3, %v2014_v22, %v4206_v15 }
 0x158   : > { %2639 = vrot.lane.b32.xlu1 %v2585_v13, %s3381_s28  ;;  %3178 = vmatprep.subr.msk.mxu1 %vm662_vm7, %v655_v27  ;;  %v1978_v21 = vpop.permute.xlu0 %1977  ;;  %v645_v33 = vsel %vm402_vm3, %v644_v39, %v4197_v44  ;;  %v2812_v44 = vcombine.low %v4284_v19, %v4293_v29  ;;  %v2016_v13 = vsel %vm404_vm4, %v2015_v34, %v1974_v46  ;;  %v3343_v27 = vld [vmem:[%s3427_s19 + $0x25] ss:$48 sps:$4 sm:$0xff]  }
 0x159   : > { %v646_v42 = vsel %vm404_vm4, %v645_v33, %v4220_v36  ;;  %v3177_v36 = vld [vmem:[%s4623_s1 + $0x8] sm:$0xff]  ;;  %v2017_v3 = vsel %vm406_vm5, %v2016_v13, %v1978_v21  ;;  %v2912_v15 = vcombine.high %v4318_v1, %v3372_v9  ;;  %v1275_v58 = vrot.slane %v1261_v55, %v3645_v32 }
 0x15a   : > { %v2010_v49 = vpop.permute.xlu1 %2009  ;;  %1021 = vrot.lane.b32.xlu0 %v927_v47, %s3381_s28  ;;  %v647_v61 = vsel %vm406_vm5, %v646_v42, %v608_v41  ;;  %v1224_v41 = vcombine.high %v4309_v37, %v3372_v9  ;;  %v3220_v47 = vld [vmem:[%s4623_s1 + $0x28] sm:$0xff]  ;;  %v4357_v53 = vrot.slane %v2812_v44, %v3645_v32  ;;  %v1193_v60 = vcombine.high %v4241_v10, %v4244_v28 }
 0x15b   : > { %v2025_v5 = vsel %vm408_vm6, %v2024_v51, %v2010_v49  ;;  %v2895_v6 = vrot.slane %v2881_v48, %v3645_v32  ;;  %v2813_v28 = vcombine.high %v4284_v19, %v4293_v29  ;;  %v1293_v7 = vcombine.high %v1275_v58, %v3372_v9  ;;  %v3344_v19 = vld [vmem:[%s3427_s19 + $0x5] ss:$48 sps:$4 sm:$0xff]   ;;  %v3345_v29 = vld [vmem:[%s3427_s19 + $0x1d] ss:$48 sps:$4 sm:$0xff]  }
 0x15c   : > { %2611 = vrot.lane.b32.xlu1 %v2517_v35, %s3381_s28  ;;  %3221 = vmatprep.subr.msk.mxu0 %vm662_vm7, %v2025_v5  ;;  %v612_v23 = vpop.permute.xlu0 %611  ;;  %v2844_v17 = vcombine.high %v4357_v53, %v3372_v9  ;;  %v1207_v10 = vrot.slane %v1193_v60, %v3645_v32  ;;  %v1243_v21 = vrot.slane %v3342_v56, %v3450_v14 }
 0x15d   : > { %v648_v30 = vsel %vm408_vm6, %v647_v61, %v612_v23  ;;  %v1259_v4 = vrot.slane %v3343_v27, %v3450_v14  ;;  %v2849_v39 = vcombine.high %v3903_v26, %v3926_v40  ;;  %v2865_v12 = vcombine.high %v3934_v62, %v3947_v52 }
 0x15e   : > { %v1982_v0 = vpop.permute.xlu1 %1981  ;;  %3179 = vmatpush1.msk.msra.mxu1 %vm662_vm7, %v648_v30  ;;  %1325 = vrot.lane.b32.xlu0 %v1292_v18, %s3378_s25  ;;  %v2827_v51 = vrot.slane %v2813_v28, %v3645_v32  ;;  %v2913_v62 = vcombine.high %v2895_v6, %v3372_v9  ;;  %v1225_v52 = vcombine.high %v1207_v10, %v3372_v9 }
 0x15f   : > { %v2018_v46 = vsel %vm408_vm6, %v2017_v3, %v1982_v0  ;;  %3180 = vmatmul.mubr.msk.f32.vlgmr.msra.gmra.mrb[0].mxu1 %vm658_vm8, %v3177_v36  ;;  %v1276_v49 = vcombine.low %v1243_v21, %v1259_v4  ;;  %v2863_v22 = vrot.slane %v2849_v39, %v3450_v14  ;;  %v2879_v26 = vrot.slane %v2865_v12, %v3450_v14 }
 0x160   : > { %2945 = vrot.lane.b32.xlu1 %v2912_v15, %s3378_s25  ;;  %3222 = vmatpush1.msk.msra.mxu0 %vm662_vm7, %v2018_v46  ;;  %v4353_v35 = vpop.permute.xlu0 %369  ;;  %v1175_v42 = vrot.slane %v3344_v19, %v3450_v14  ;;  %v1191_v5 = vrot.slane %v3345_v29, %v3450_v14  ;;  %v2781_v55 = vcombine.high %v3938_v38, %v3951_v11 }
 0x161   : > { %3223 = vmatmul.mubr.msk.f32.vlgmr.msra.gmra.mrb[0].mxu0 %vm658_vm8, %v3220_v47  ;;  %813 = vmatprep.mubr.f32.mxu1 %v3372_v9  ;;  %v2797_v44 = vcombine.high %v3959_v45, %v3973_v24  ;;  %v1284_v61 = vrot.slane %v1276_v49, %v3645_v32  ;;  %v2896_v23 = vcombine.low %v2863_v22, %v2879_v26 }
 0x162   : > { %v4363_v59 = vpop.permute.xlu1 %2285  ;;  %1297 = vrot.lane.b32.xlu0 %v1224_v41, %s3378_s25  ;;  %2401 = vmatprep.mubr.f32.mxu0 %v3372_v9  ;;  %v1208_v13 = vcombine.low %v1175_v42, %v1191_v5  ;;  %v2795_v30 = vrot.slane %v2781_v55, %v3450_v14  ;;  %v2845_v11 = vcombine.high %v2827_v51, %v3372_v9 }
 0x163   : > { %v2811_v3 = vrot.slane %v2797_v44, %v3450_v14  ;;  %v2904_v24 = vrot.slane %v2896_v23, %v3645_v32  ;;  %v1294_v14 = vcombine.high %v1284_v61, %v3372_v9  ;;  %v1277_v48 = vcombine.high %v1243_v21, %v1259_v4 }
 0x164   : > { %1329 = vrot.lane.b32.xlu1 %v1275_v58, %s3375_s22  ;;  %v4370_v18 = vpop.permute.xlu0 %341  ;;  %v1216_v0 = vrot.slane %v1208_v13, %v3645_v32 }
 0x165   : > { %v2828_v15 = vcombine.low %v2795_v30, %v2811_v3  ;;  %v2829_v29 = vcombine.high %v2795_v30, %v2811_v3 }
 0x166   : > { %v4376_v2 = vpop.permute.xlu1 %373  ;;  %2917 = vrot.lane.b32.xlu0 %v2844_v17, %s3378_s25  ;;  %v2914_v17 = vcombine.high %v2904_v24, %v3372_v9  ;;  %v1226_v56 = vcombine.high %v1216_v0, %v3372_v9 }
 0x167   : > { %v2836_v58 = vrot.slane %v2828_v15, %v3645_v32  ;;  %v2843_v44 = vrot.slane %v2829_v29, %v3645_v32 }
 0x168   : > { %2949 = vrot.lane.b32.xlu1 %v2895_v6, %s3375_s22  ;;  %v4384_v50 = vpop.permute.xlu0 %2257  ;;  %v1291_v6 = vrot.slane %v1277_v48, %v3645_v32 }
 0x169   : > { %v2846_v4 = vcombine.high %v2836_v58, %v3372_v9  ;;  %v2847_v15 = vcombine.high %v2843_v44, %v3372_v9 }
 0x16a   : > { %v4393_v57 = vpop.permute.xlu1 %2289  ;;  %1301 = vrot.lane.b32.xlu0 %v1207_v10, %s3375_s22  ;;  %v2897_v10 = vcombine.high %v2863_v22, %v2879_v26  ;;  %v1295_v49 = vcombine.high %v1291_v6, %v3372_v9  ;;  %v410_v22 = vsel %vm396_vm0, %v3873_v25, %v4353_v35  ;;  %v2319_v25 = vsel %vm396_vm0, %v3881_v20, %v4363_v59 }
 0x16b   : > { %v411_v26 = vsel %vm398_vm1, %v410_v22, %v4376_v2  ;;  %v2320_v2 = vsel %vm398_vm1, %v2319_v25, %v4393_v57 }
 0x16c   : > { %1333 = vrot.lane.b32.xlu1 %v1293_v7, %s3379_s26  ;;  %v4399_v33 = vpop.permute.xlu0 %345  ;;  %v1209_v7 = vcombine.high %v1175_v42, %v1191_v5  ;;  %v2911_v12 = vrot.slane %v2897_v10, %v3645_v32  ;;  %v3382_v42 = vmov 0  }
 0x16d   : > { %3317 = vset.pattern.permute.xlu0 %v3382_v42 }
 0x16e   : > { %v378_v40 = vpop.permute.xlu1 %377  ;;  %2921 = vrot.lane.b32.xlu0 %v2827_v51, %s3375_s22  ;;  %v1223_v19 = vrot.slane %v1209_v7, %v3645_v32  ;;  %v2915_v23 = vcombine.high %v2911_v12, %v3372_v9  ;;  %v397_v32 = vsel %vm396_vm0, %v3893_v31, %v4370_v18 }
 0x16f   : > { %v399_v57 = vsel %vm398_vm1, %v397_v32, %v4399_v33 }
 0x170   : > { %2953 = vrot.lane.b32.xlu1 %v2913_v62, %s3379_s26  ;;  %v4414_v34 = vpop.permute.xlu0 %2261  ;;  %v1227_v13 = vcombine.high %v1223_v19, %v3372_v9 }
 0x172   : > { %v4417_v36 = vpop.permute.xlu1 %2293  ;;  %1305 = vrot.lane.b32.xlu0 %v1225_v52, %s3379_s26  ;;  %v412_v52 = vsel %vm400_vm2, %v411_v26, %v378_v40 }
 0x173   : > { %v2321_v20 = vsel %vm400_vm2, %v2320_v2, %v4417_v36 }
 0x174   : > { %1337 = vrot.lane.b32.xlu1 %v1284_v61, %s3376_s23  ;;  %v4423_v38 = vpop.permute.xlu0 %349 }
 0x175   : > { %v401_v31 = vsel %vm400_vm2, %v399_v57, %v4423_v38 }
 0x176   : > { %v382_v45 = vpop.permute.xlu1 %381  ;;  %2925 = vrot.lane.b32.xlu0 %v2845_v11, %s3379_s26  ;;  %v4638_v11 = vld [vmem:[#allocation2_spill] sm:$0xff]  ;;  %s3262_s26 = sshll.u32 %s4644_s12, 4 }
 0x177   : > { %v413_v5 = vsel %vm402_vm3, %v412_v52, %v382_v45  ;;  %v2312_v45 = vsel %vm396_vm0, %v4638_v11, %v4384_v50  ;;  %s192_s29 = scalar_lea.vmem %s4625_s3, %s3262_s26 }
 0x178   : > { %2957 = vrot.lane.b32.xlu1 %v2904_v24, %s3376_s23  ;;  %v4430_v41 = vpop.permute.xlu0 %2265  ;;  %v2313_v36 = vsel %vm398_vm1, %v2312_v45, %v4414_v34  ;;  %v3070_v34 = vld [vmem:[%s4624_s2] sm:$0xff] }
 0x179   : > { %v2314_v50 = vsel %vm400_vm2, %v2313_v36, %v4430_v41  ;;  %v417_v41 = vld [vmem:[%s4623_s1] sm:$0xff] }
 0x17a   : > { %v2298_v47 = vpop.permute.xlu1 %2297  ;;  %1309 = vrot.lane.b32.xlu0 %v1216_v0, %s3376_s23 }
 0x17b   : > { %v2322_v30 = vsel %vm402_vm3, %v2321_v20, %v2298_v47 }
 0x17c   : > { %1341 = vrot.lane.b32.xlu1 %v1294_v14, %s3380_s27  ;;  %v354_v46 = vpop.permute.xlu0 %353 }
 0x17d   : > { %v403_v33 = vsel %vm402_vm3, %v401_v31, %v354_v46 }
 0x17e   : > { %v386_v60 = vpop.permute.xlu1 %385  ;;  %2929 = vrot.lane.b32.xlu0 %v2836_v58, %s3376_s23 }
 0x17f   : > { %v414_v35 = vsel %vm404_vm4, %v413_v5, %v386_v60 }
 0x180   : > { %2961 = vrot.lane.b32.xlu1 %v2914_v17, %s3380_s27  ;;  %v2270_v27 = vpop.permute.xlu0 %2269 }
 0x181   : > { %v2315_v47 = vsel %vm402_vm3, %v2314_v50, %v2270_v27  ;;  %v3232_v27 = vld [vmem:[%s4623_s1 + $0x30] sm:$0xff] }
 0x182   : > { %v2302_v28 = vpop.permute.xlu1 %2301  ;;  %1313 = vrot.lane.b32.xlu0 %v1226_v56, %s3380_s27 }
 0x183   : > { %v2323_v18 = vsel %vm404_vm4, %v2322_v30, %v2302_v28 }
 0x184   : > { %1345 = vrot.lane.b32.xlu1 %v1291_v6, %s3377_s24  ;;  %v358_v21 = vpop.permute.xlu0 %357 }
 0x185   : > { %v405_v14 = vsel %vm404_vm4, %v403_v33, %v358_v21 }
 0x186   : > { %v390_v39 = vpop.permute.xlu1 %389  ;;  %2933 = vrot.lane.b32.xlu0 %v2846_v4, %s3380_s27 }
 0x187   : > { %v415_v40 = vsel %vm406_vm5, %v414_v35, %v390_v39 }
 0x188   : > { %2965 = vrot.lane.b32.xlu1 %v2911_v12, %s3377_s24  ;;  %v2274_v51 = vpop.permute.xlu0 %2273 }
 0x189   : > { %v2316_v48 = vsel %vm404_vm4, %v2315_v47, %v2274_v51 }
 0x18a   : > { %v2306_v62 = vpop.permute.xlu1 %2305  ;;  %1317 = vrot.lane.b32.xlu0 %v1223_v19, %s3377_s24 }
 0x18b   : > { %v2324_v24 = vsel %vm406_vm5, %v2323_v18, %v2306_v62 }
 0x18c   : > { %1349 = vrot.lane.b32.xlu1 %v1295_v49, %s3381_s28  ;;  %v362_v55 = vpop.permute.xlu0 %361 }
 0x18d   : > { %v407_v46 = vsel %vm406_vm5, %v405_v14, %v362_v55 }
 0x18e   : > { %v394_v61 = vpop.permute.xlu1 %393  ;;  %2937 = vrot.lane.b32.xlu0 %v2843_v44, %s3377_s24 }
 0x18f   : > { %v416_v59 = vsel %vm408_vm6, %v415_v40, %v394_v61 }
 0x190   : > { %2969 = vrot.lane.b32.xlu1 %v2915_v23, %s3381_s28  ;;  %3181 = vmatprep.subr.msk.mxu1 %vm662_vm7, %v416_v59  ;;  %v2278_v3 = vpop.permute.xlu0 %2277 }
 0x191   : > { %v2317_v17 = vsel %vm406_vm5, %v2316_v48, %v2278_v3 }
 0x192   : > { %v2310_v0 = vpop.permute.xlu1 %2309  ;;  %1321 = vrot.lane.b32.xlu0 %v1227_v13, %s3381_s28 }
 0x193   : > { %v2325_v38 = vsel %vm408_vm6, %v2324_v24, %v2310_v0 }
 0x194   : > { %2941 = vrot.lane.b32.xlu1 %v2847_v15, %s3381_s28  ;;  %3233 = vmatprep.subr.msk.mxu0 %vm662_vm7, %v2325_v38  ;;  %v366_v58 = vpop.permute.xlu0 %365 }
 0x195   : > { %v409_v60 = vsel %vm408_vm6, %v407_v46, %v366_v58  ;;  %v3184_v58 = vld [vmem:[%s4623_s1 + $0x10] sm:$0xff] }
 0x196   : > { %v2282_v56 = vpop.permute.xlu1 %2281  ;;  %3182 = vmatpush1.msk.msra.mxu1 %vm662_vm7, %v409_v60  ;;  %3073 = vperm.xlu0 %3317, %v3070_v34  }
 0x197   : > { %v2318_v6 = vsel %vm408_vm6, %v2317_v17, %v2282_v56  ;;  %3183 = vmatmul.mubr.msk.f32.vlgmr.msra.gmra.mrb[0].mxu1 %vm658_vm8, %v417_v41  ;;  %v3244_v56 = vld [vmem:[%s4623_s1 + $0x38] sm:$0xff] }
 0x198   : > { %3234 = vmatpush1.msk.msra.mxu0 %vm662_vm7, %v2318_v6  ;;  %v1026_v10 = vpop.permute.xlu0 %1025  ;;  %1141 = vmatprep.mubr.f32.mxu1 %v3372_v9 }
 0x199   : > { %3235 = vmatmul.mubr.msk.f32.vlgmr.msra.gmra.mrb[0].mxu0 %vm658_vm8, %v3232_v27  ;;  %v1059_v2 = vsel %vm396_vm0, %v4069_v8, %v1026_v10 }
 0x19a   : > { %v2616_v28 = vpop.permute.xlu1 %2615  ;;  %2731 = vmatprep.mubr.f32.mxu0 %v3372_v9 }
 0x19b   : > { %v2649_v20 = vsel %vm396_vm0, %v4080_v54, %v2616_v28 }
 0x19c   : > { %v998_v7 = vpop.permute.xlu0 %997 }
 0x19d   : > { %v1052_v8 = vsel %vm396_vm0, %v4088_v43, %v998_v7 }
 0x19e   : > { %v1030_v21 = vpop.permute.xlu1 %1029 }
 0x19f   : > { %v1060_v40 = vsel %vm398_vm1, %v1059_v2, %v1030_v21 }
 0x1a0   : > { %v2588_v4 = vpop.permute.xlu0 %2587 }
 0x1a1   : > { %v2642_v36 = vsel %vm396_vm0, %v4104_v63, %v2588_v4 }
 0x1a2   : > { %v2620_v39 = vpop.permute.xlu1 %2619 }
 0x1a3   : > { %v2650_v57 = vsel %vm398_vm1, %v2649_v20, %v2620_v39 }
 0x1a4   : > { %v1002_v12 = vpop.permute.xlu0 %1001 }
 0x1a5   : > { %v1053_v31 = vsel %vm398_vm1, %v1052_v8, %v1002_v12 }
 0x1a6   : > { %v1034_v19 = vpop.permute.xlu1 %1033 }
 0x1a7   : > { %v1061_v23 = vsel %vm400_vm2, %v1060_v40, %v1034_v19 }
 0x1a8   : > { %v2592_v29 = vpop.permute.xlu0 %2591 }
 0x1a9   : > { %v2643_v43 = vsel %vm398_vm1, %v2642_v36, %v2592_v29 }
 0x1aa   : > { %v2624_v51 = vpop.permute.xlu1 %2623 }
 0x1ab   : > { %v2651_v11 = vsel %vm400_vm2, %v2650_v57, %v2624_v51 }
 0x1ac   : > { %v1006_v49 = vpop.permute.xlu0 %1005 }
 0x1ad   : > { %v1054_v33 = vsel %vm400_vm2, %v1053_v31, %v1006_v49 }
 0x1ae   : > { %v1038_v22 = vpop.permute.xlu1 %1037 }
 0x1af   : > { %v1062_v13 = vsel %vm402_vm3, %v1061_v23, %v1038_v22 }
 0x1b0   : > { %v2596_v26 = vpop.permute.xlu0 %2595 }
 0x1b1   : > { %v2644_v14 = vsel %vm400_vm2, %v2643_v43, %v2596_v26 }
 0x1b2   : > { %v2628_v62 = vpop.permute.xlu1 %2627 }
 0x1b3   : > { %v2652_v18 = vsel %vm402_vm3, %v2651_v11, %v2628_v62 }
 0x1b4   : > { %v1010_v52 = vpop.permute.xlu0 %1009 }
 0x1b5   : > { %v1055_v0 = vsel %vm402_vm3, %v1054_v33, %v1010_v52 }
 0x1b6   : > { %v1042_v42 = vpop.permute.xlu1 %1041 }
 0x1b7   : > { %v1063_v59 = vsel %vm404_vm4, %v1062_v13, %v1042_v42 }
 0x1b8   : > { %v2600_v5 = vpop.permute.xlu0 %2599 }
 0x1b9   : > { %v2645_v47 = vsel %vm402_vm3, %v2644_v14, %v2600_v5  ;;  %v3196_v14 = vld [vmem:[%s4623_s1 + $0x18] sm:$0xff] }
 0x1ba   : > { %v2632_v55 = vpop.permute.xlu1 %2631 }
 0x1bb   : > { %v2653_v24 = vsel %vm404_vm4, %v2652_v18, %v2632_v55 }
 0x1bc   : > { %v1014_v44 = vpop.permute.xlu0 %1013 }
 0x1bd   : > { %v1056_v38 = vsel %vm404_vm4, %v1055_v0, %v1014_v44 }
 0x1be   : > { %v1046_v25 = vpop.permute.xlu1 %1045 }
 0x1bf   : > { %v1064_v30 = vsel %vm406_vm5, %v1063_v59, %v1046_v25 }
 0x1c0   : > { %v2604_v35 = vpop.permute.xlu0 %2603 }
 0x1c1   : > { %v2646_v41 = vsel %vm404_vm4, %v2645_v47, %v2604_v35 }
 0x1c2   : > { %v2636_v61 = vpop.permute.xlu1 %2635 }
 0x1c3   : > { %v2654_v15 = vsel %vm406_vm5, %v2653_v24, %v2636_v61 }
 0x1c4   : > { %v1018_v32 = vpop.permute.xlu0 %1017 }
 0x1c5   : > { %v1057_v63 = vsel %vm406_vm5, %v1056_v38, %v1018_v32 }
 0x1c6   : > { %v1050_v3 = vpop.permute.xlu1 %1049 }
 0x1c7   : > { %v1065_v45 = vsel %vm408_vm6, %v1064_v30, %v1050_v3 }
 0x1c8   : > { %3185 = vmatprep.subr.msk.mxu1 %vm662_vm7, %v1065_v45  ;;  %v2608_v54 = vpop.permute.xlu0 %2607 }
 0x1c9   : > { %v2647_v60 = vsel %vm406_vm5, %v2646_v41, %v2608_v54 }
 0x1ca   : > { %v2640_v50 = vpop.permute.xlu1 %2639 }
 0x1cb   : > { %v2655_v34 = vsel %vm408_vm6, %v2654_v15, %v2640_v50 }
 0x1cc   : > { %3245 = vmatprep.subr.msk.mxu0 %vm662_vm7, %v2655_v34  ;;  %v1022_v46 = vpop.permute.xlu0 %1021 }
 0x1cd   : > { %v1058_v48 = vsel %vm408_vm6, %v1057_v63, %v1022_v46  ;;  %v3256_v46 = vld [vmem:[%s4623_s1 + $0x40] sm:$0xff] }
 0x1ce   : > { %v2612_v17 = vpop.permute.xlu1 %2611  ;;  %3186 = vmatpush1.msk.msra.mxu1 %vm662_vm7, %v1058_v48 }
 0x1cf   : > { %v2648_v27 = vsel %vm408_vm6, %v2647_v60, %v2612_v17  ;;  %3187 = vmatmul.mubr.msk.f32.vlgmr.msra.gmra.mrb[0].mxu1 %vm658_vm8, %v3184_v58 }
 0x1d0   : > { %3246 = vmatpush1.msk.msra.mxu0 %vm662_vm7, %v2648_v27  ;;  %v1326_v6 = vpop.permute.xlu0 %1325  ;;  %1441 = vmatprep.mubr.f32.mxu1 %v3372_v9 }
 0x1d1   : > { %3247 = vmatmul.mubr.msk.f32.vlgmr.msra.gmra.mrb[0].mxu0 %vm658_vm8, %v3244_v56 }
 0x1d2   : > { %v2946_v10 = vpop.permute.xlu1 %2945  ;;  %3061 = vmatprep.mubr.f32.mxu0 %v3372_v9  ;;  %v1359_v9 = vsel %vm396_vm0, %v4256_v16, %v1326_v6 }
 0x1d3   : > { %v2979_v13 = vsel %vm396_vm0, %v4318_v1, %v2946_v10 }
 0x1d4   : > { %v1298_v28 = vpop.permute.xlu0 %1297 }
 0x1d5   : > { %v1352_v16 = vsel %vm396_vm0, %v4309_v37, %v1298_v28 }
 0x1d6   : > { %v1330_v7 = vpop.permute.xlu1 %1329 }
 0x1d7   : > { %v1360_v35 = vsel %vm398_vm1, %v1359_v9, %v1330_v7 }
 0x1d8   : > { %v2918_v21 = vpop.permute.xlu0 %2917 }
 0x1d9   : > { %v2972_v45 = vsel %vm396_vm0, %v4357_v53, %v2918_v21 }
 0x1da   : > { %v2950_v4 = vpop.permute.xlu1 %2949 }
 0x1db   : > { %v2980_v20 = vsel %vm398_vm1, %v2979_v13, %v2950_v4 }
 0x1dc   : > { %v1302_v39 = vpop.permute.xlu0 %1301 }
 0x1dd   : > { %v1353_v8 = vsel %vm398_vm1, %v1352_v16, %v1302_v39 }
 0x1de   : > { %v1334_v12 = vpop.permute.xlu1 %1333 }
 0x1df   : > { %v1361_v40 = vsel %vm400_vm2, %v1360_v35, %v1334_v12 }
 0x1e0   : > { %v2922_v19 = vpop.permute.xlu0 %2921 }
 0x1e1   : > { %v2973_v37 = vsel %vm398_vm1, %v2972_v45, %v2922_v19 }
 0x1e2   : > { %v2954_v29 = vpop.permute.xlu1 %2953 }
 0x1e3   : > { %v2981_v30 = vsel %vm400_vm2, %v2980_v20, %v2954_v29 }
 0x1e4   : > { %v1306_v51 = vpop.permute.xlu0 %1305 }
 0x1e5   : > { %v1354_v31 = vsel %vm400_vm2, %v1353_v8, %v1306_v51 }
 0x1e6   : > { %v1338_v49 = vpop.permute.xlu1 %1337 }
 0x1e7   : > { %v1362_v61 = vsel %vm402_vm3, %v1361_v40, %v1338_v49 }
 0x1e8   : > { %v2926_v22 = vpop.permute.xlu0 %2925 }
 0x1e9   : > { %v2974_v24 = vsel %vm400_vm2, %v2973_v37, %v2926_v22 }
 0x1ea   : > { %v2958_v26 = vpop.permute.xlu1 %2957 }
 0x1eb   : > { %v2982_v11 = vsel %vm402_vm3, %v2981_v30, %v2958_v26 }
 0x1ec   : > { %v1310_v62 = vpop.permute.xlu0 %1309 }
 0x1ed   : > { %v1355_v54 = vsel %vm402_vm3, %v1354_v31, %v1310_v62 }
 0x1ee   : > { %v1342_v52 = vpop.permute.xlu1 %1341 }
 0x1ef   : > { %v1363_v32 = vsel %vm404_vm4, %v1362_v61, %v1342_v52 }
 0x1f0   : > { %v2930_v42 = vpop.permute.xlu0 %2929 }
 0x1f1   : > { %v2975_v15 = vsel %vm402_vm3, %v2974_v24, %v2930_v42 }
 0x1f2   : > { %v2962_v5 = vpop.permute.xlu1 %2961 }
 0x1f3   : > { %v2983_v18 = vsel %vm404_vm4, %v2982_v11, %v2962_v5 }
 0x1f4   : > { %v1314_v55 = vpop.permute.xlu0 %1313 }
 0x1f5   : > { %v1356_v43 = vsel %vm404_vm4, %v1355_v54, %v1314_v55 }
 0x1f6   : > { %v1346_v44 = vpop.permute.xlu1 %1345 }
 0x1f7   : > { %v1364_v59 = vsel %vm406_vm5, %v1363_v32, %v1346_v44 }
 0x1f8   : > { %v2934_v25 = vpop.permute.xlu0 %2933 }
 0x1f9   : > { %v2976_v38 = vsel %vm404_vm4, %v2975_v15, %v2934_v25 }
 0x1fa   : > { %v2966_v2 = vpop.permute.xlu1 %2965 }
 0x1fb   : > { %v2984_v36 = vsel %vm406_vm5, %v2983_v18, %v2966_v2 }
 0x1fc   : > { %v1318_v23 = vpop.permute.xlu0 %1317 }
 0x1fd   : > { %v1357_v53 = vsel %vm406_vm5, %v1356_v43, %v1318_v23 }
 0x1fe   : > { %v1350_v57 = vpop.permute.xlu1 %1349 }
 0x1ff   : > { %v1365_v3 = vsel %vm408_vm6, %v1364_v59, %v1350_v57 }
 0x200   : > { %3197 = vmatprep.subr.msk.mxu1 %vm662_vm7, %v1365_v3  ;;  %v2938_v1 = vpop.permute.xlu0 %2937 }
 0x201   : > { %v2977_v47 = vsel %vm406_vm5, %v2976_v38, %v2938_v1 }
 0x202   : > { %v2970_v33 = vpop.permute.xlu1 %2969 }
 0x203   : > { %v2985_v0 = vsel %vm408_vm6, %v2984_v36, %v2970_v33 }
 0x204   : > { %3257 = vmatprep.subr.msk.mxu0 %vm662_vm7, %v2985_v0  ;;  %v1322_v50 = vpop.permute.xlu0 %1321 }
 0x205   : > { %v1358_v34 = vsel %vm408_vm6, %v1357_v53, %v1322_v50 }
 0x206   : > { %v2942_v63 = vpop.permute.xlu1 %2941  ;;  %3198 = vmatpush1.msk.msra.mxu1 %vm662_vm7, %v1358_v34 }
 0x207   : > { %v2978_v58 = vsel %vm408_vm6, %v2977_v47, %v2942_v63  ;;  %3199 = vmatmul.mubr.msk.f32.vlgmr.msra.gmra.mrb[0].mxu1 %vm658_vm8, %v3196_v14 }
 0x208   : > { %3258 = vmatpush1.msk.msra.mxu0 %vm662_vm7, %v2978_v58 }
 0x209   : > { %3259 = vmatmul.mubr.msk.f32.vlgmr.msra.gmra.mrb[0].mxu0 %vm658_vm8, %v3256_v46 }
 0x215   : > { %v3074_v17 = vpop.permute.xlu0 %3073 }
 0x2da   : > { %v1443_v41 = vpop.f32.mrb[0].mxu1 }
 0x2db   : > { %v1445_v48 = vpop.f32.mrb[1].mxu1 }
 0x2dc   : > { %v3063_v60 = vpop.f32.mrb[0].mxu0 }
 0x2dd   : > { %v3263_v56 = vadd.f32 %v3063_v60, %v1443_v41  ;;  %v3065_v27 = vpop.f32.mrb[1].mxu0 }
 0x2de   : > { %v3264_v6 = vadd.f32 %v3065_v27, %v1445_v48 }
 0x2df   : > { %v3076_v10 = vadd.f32 %v3263_v56, %v3074_v17 }
 0x2e0   : > { %v3077_v28 = vadd.f32 %v3264_v6, %v3074_v17 }
 0x2e1   : > { %3078 = vst [vmem:[%s192_s29] sm:$0xff] %v3076_v10 }
 0x2e2   : > { %3079 = vst [vmem:[%s192_s29 + $0x8] sm:$0xff] %v3077_v28 }
 0x2e3 PF: > { %s13_s14 = sadd.s32 1, %s3368_s14   ;;  %s4639_s12 = smov %s3364_s13 }
 0x2e4   : > { %p10_p5 = scmp.ge.s32.totalorder %s13_s14, 4   ;;  %s4640_s13 = smov %s4642_s15 }
 0x2e6   :  { %12 = sbr.rel (!%p10_p5) target bundleno = 2 (0x2), region = 73 }

</bundles_post_ra>
